<compile_context>
chip_gen: v7x
topology: tpu7x:2x2x1
jax: 0.10.0
libtpu: 0.0.40
codegen_flags: <defaults>
</compile_context>

<pallas_src>
import jax
import jax.numpy as jnp
from jax.experimental import pallas as pl
from jax.experimental.pallas import tpu as pltpu


# ----------------------------- fused Pallas kernel -------------------------

def _make_decoder_kernel(n_layers, batch, hid_dim):
    n_w = 3 * n_layers  # (w_ih_t, w_hh_t, b) per layer

    def kernel(tok_ref, emb_hbm, h_in_ref, c_in_ref, *rest):
        # rest = [layer weights] + [fc_w, fc_b] + [pred, h_out, c_out] + scratch
        lw = rest[:n_w]
        fc_w_ref = rest[n_w + 0]
        fc_b_ref = rest[n_w + 1]
        pred_ref = rest[n_w + 2]
        h_out_ref = rest[n_w + 3]
        c_out_ref = rest[n_w + 4]
        emb_buf = rest[n_w + 5]    # VMEM [B, E]
        emb_sem = rest[n_w + 6]    # DMA sems (B,)
        x_scr = rest[n_w + 7]      # VMEM [B, H] -- final hidden, reused per vocab tile

        j = pl.program_id(0)
        H = hid_dim

        # ---- LSTM stack: computed once, at the first vocab tile -------------
        @pl.when(j == 0)
        def _():
            # Embedding gather: DMA only the B required rows from HBM.
            copies = []
            for b in range(batch):
                cp = pltpu.make_async_copy(
                    emb_hbm.at[pl.ds(tok_ref[b], 1), :],
                    emb_buf.at[pl.ds(b, 1), :],
                    emb_sem.at[b],
                )
                cp.start()
                copies.append(cp)

            # Hide gather latency: layer-0 hidden-path matmul does not need x.
            w_ih0_ref, w_hh0_ref, b0_ref = lw[0], lw[1], lw[2]
            gates_h0 = (
                jnp.dot(h_in_ref[0], w_hh0_ref[...],
                        preferred_element_type=jnp.float32)
                + b0_ref[...]
            )

            for cp in copies:
                cp.wait()

            x = emb_buf[...]                          # [B, E]; dropout == identity

            for layer in range(n_layers):
                if layer == 0:
                    gates = (
                        jnp.dot(x, w_ih0_ref[...],
                                preferred_element_type=jnp.float32)
                        + gates_h0
                    )
                else:
                    w_ih_ref = lw[3 * layer + 0]
                    w_hh_ref = lw[3 * layer + 1]
                    b_ref = lw[3 * layer + 2]
                    gates = (
                        jnp.dot(x, w_ih_ref[...],
                                preferred_element_type=jnp.float32)
                        + jnp.dot(h_in_ref[layer], w_hh_ref[...],
                                  preferred_element_type=jnp.float32)
                        + b_ref[...]
                    )                                 # [B, 4H]

                # H is a multiple of 128 -> lane-aligned slices (no relayout).
                i_g = jax.nn.sigmoid(gates[:, 0 * H:1 * H])
                f_g = jax.nn.sigmoid(gates[:, 1 * H:2 * H])
                g_g = jnp.tanh(gates[:, 2 * H:3 * H])
                o_g = jax.nn.sigmoid(gates[:, 3 * H:4 * H])

                c_new = f_g * c_in_ref[layer] + i_g * g_g
                h_new = o_g * jnp.tanh(c_new)

                h_out_ref[layer] = h_new
                c_out_ref[layer] = c_new
                x = h_new                              # inter-layer dropout == identity

            x_scr[...] = x

        # ---- fc_out: one lane-dense vocab tile per grid step ----------------
        pred_ref[...] = (
            jnp.dot(x_scr[...], fc_w_ref[...], preferred_element_type=jnp.float32)
            + fc_b_ref[...]
        )

    return kernel


def decoder_forward_pallas(params, tokens, hidden, cell, *, tile_v):
    n_layers, B, H = hidden.shape
    V, E = params["embedding"].shape

    # Lane/sublane-dense shape requirements (pad externally otherwise).
    assert B % 8 == 0, "batch must be a multiple of 8 (pad it)"
    assert H % 128 == 0 and E % 128 == 0, "hid/emb dims must be multiples of 128"
    assert tile_v % 128 == 0 and V % tile_v == 0, "vocab tile must divide vocab, %128"

    const3 = lambda j, tok: (0, 0, 0)
    const2 = lambda j, tok: (0, 0)

    in_specs = [
        pl.BlockSpec(memory_space=pl.ANY),                # embedding table stays in HBM
        pl.BlockSpec((n_layers, B, H), const3),           # hidden in
        pl.BlockSpec((n_layers, B, H), const3),           # cell in
    ]
    flat_w = []
    for layer in range(n_layers):
        lw = params["lstm"][layer]
        in_dim = lw["w_ih_t"].shape[0]
        in_specs += [
            pl.BlockSpec((in_dim, 4 * H), const2),
            pl.BlockSpec((H, 4 * H), const2),
            pl.BlockSpec((1, 4 * H), const2),
        ]
        flat_w += [lw["w_ih_t"], lw["w_hh_t"], lw["b"]]
    in_specs += [
        pl.BlockSpec((H, tile_v), lambda j, tok: (0, j)),  # fc W^T vocab tile
        pl.BlockSpec((1, tile_v), lambda j, tok: (0, j)),  # fc b vocab tile
    ]

    out_specs = (
        pl.BlockSpec((B, tile_v), lambda j, tok: (0, j)),  # prediction tile
        pl.BlockSpec((n_layers, B, H), const3),            # hidden out
        pl.BlockSpec((n_layers, B, H), const3),            # cell out
    )
    out_shape = (
        jax.ShapeDtypeStruct((B, V), jnp.float32),
        jax.ShapeDtypeStruct((n_layers, B, H), jnp.float32),
        jax.ShapeDtypeStruct((n_layers, B, H), jnp.float32),
    )
    scratch_shapes = [
        pltpu.VMEM((B, E), jnp.float32),     # gathered embedding rows
        pltpu.SemaphoreType.DMA((B,)),       # per-row gather DMA semaphores
        pltpu.VMEM((B, H), jnp.float32),     # final hidden state (reused per tile)
    ]

    lstm_flops = 2 * B * sum(
        params["lstm"][l]["w_ih_t"].shape[0] * 4 * H + H * 4 * H
        for l in range(n_layers))
    fc_flops = 2 * B * H * V
    cost = pl.CostEstimate(
        flops=lstm_flops + fc_flops,
        transcendentals=n_layers * B * 5 * H,
        bytes_accessed=4 * (B * E + 4 * n_layers * B * H
                            + sum(int(w.size) for w in flat_w)
                            + H * V + V + B * V),
    )

    kernel = _make_decoder_kernel(n_layers, B, H)
    pred, h_out, c_out = pl.pallas_call(
        kernel,
        out_shape=out_shape,
        grid_spec=pltpu.PrefetchScalarGridSpec(
            num_scalar_prefetch=1,                 # tokens -> SMEM
            grid=(V // tile_v,),
            in_specs=in_specs,
            out_specs=out_specs,
            scratch_shapes=scratch_shapes,
        ),
        compiler_params=pltpu.CompilerParams(
            dimension_semantics=("arbitrary",),    # LSTM computed once at step 0
        ),
        # alias hidden->h_out, cell->c_out (indices count the scalar-prefetch arg)
        input_output_aliases={2: 1, 3: 2},
        cost_estimate=cost,
    )(tokens, params["embedding"], hidden, cell, *flat_w,
      params["fc_w_t"], params["fc_b"])
    return pred, h_out, c_out


decoder_forward = jax.jit(decoder_forward_pallas, static_argnames=("tile_v",))


# ------------------------------ parameters ---------------------------------

def init_decoder_params(key, output_dim, emb_dim, hid_dim, n_layers):
    """Deterministic parameter init (uniform, PyTorch-style 1/sqrt(hid) scale)."""
    params = {}
    k = key
    scale = 1.0 / jnp.sqrt(hid_dim)

    k, sub = jax.random.split(k)
    params["embedding"] = jax.random.uniform(
        sub, (output_dim, emb_dim), jnp.float32, -1.0, 1.0)

    layers = []
    for layer in range(n_layers):
        in_dim = emb_dim if layer == 0 else hid_dim
        k, k1, k2, k3, k4 = jax.random.split(k, 5)
        w_ih_t = jax.random.uniform(k1, (in_dim, 4 * hid_dim), jnp.float32,
                                    -scale, scale)
        w_hh_t = jax.random.uniform(k2, (hid_dim, 4 * hid_dim), jnp.float32,
                                    -scale, scale)
        b_ih = jax.random.uniform(k3, (4 * hid_dim,), jnp.float32, -scale, scale)
        b_hh = jax.random.uniform(k4, (4 * hid_dim,), jnp.float32, -scale, scale)
        layers.append({
            "w_ih_t": w_ih_t,
            "w_hh_t": w_hh_t,
            "b": (b_ih + b_hh).reshape(1, 4 * hid_dim),
        })
    params["lstm"] = layers

    k, k1, k2 = jax.random.split(k, 3)
    params["fc_w_t"] = jax.random.uniform(k1, (hid_dim, output_dim), jnp.float32,
                                          -scale, scale)
    params["fc_b"] = jax.random.uniform(k2, (1, output_dim), jnp.float32,
                                        -scale, scale)
    return params


# Pure-JAX reference (no Pallas) for a correctness sanity check.
def decoder_forward_ref(params, tokens, hidden, cell):
    embedded = jnp.take(params["embedding"], tokens, axis=0)
    n_layers = hidden.shape[0]
    H = hidden.shape[2]
    x = embedded
    new_h, new_c = [], []
    for layer in range(n_layers):
        lw = params["lstm"][layer]
        gates = x @ lw["w_ih_t"] + hidden[layer] @ lw["w_hh_t"] + lw["b"]
        i_g = jax.nn.sigmoid(gates[:, 0 * H:1 * H])
        f_g = jax.nn.sigmoid(gates[:, 1 * H:2 * H])
        g_g = jnp.tanh(gates[:, 2 * H:3 * H])
        o_g = jax.nn.sigmoid(gates[:, 3 * H:4 * H])
        c_l = f_g * cell[layer] + i_g * g_g
        h_l = o_g * jnp.tanh(c_l)
        new_h.append(h_l)
        new_c.append(c_l)
        x = h_l
    prediction = x @ params["fc_w_t"] + params["fc_b"]
    return prediction, jnp.stack(new_h), jnp.stack(new_c)


if __name__ == "__main__":
    # Small but lane/sublane-dense shapes: B mult of 8, dims mult of 128.
    OUTPUT_DIM = 256   # vocab size
    EMB_DIM = 128
    HID_DIM = 128
    N_LAYERS = 2
    BATCH = 8
    TILE_V = 128       # -> 2 vocab tiles, exercises the grid / pl.when path

    key = jax.random.PRNGKey(0)
    k_params, k_tok, k_h, k_c = jax.random.split(key, 4)

    params = init_decoder_params(k_params, OUTPUT_DIM, EMB_DIM, HID_DIM, N_LAYERS)
    tokens = jax.random.randint(k_tok, (BATCH,), 0, OUTPUT_DIM, dtype=jnp.int32)
    hidden = jax.random.normal(k_h, (N_LAYERS, BATCH, HID_DIM), jnp.float32)
    cell = jax.random.normal(k_c, (N_LAYERS, BATCH, HID_DIM), jnp.float32)

    pred, h_out, c_out = decoder_forward(params, tokens, hidden, cell,
                                         tile_v=TILE_V)
    jax.block_until_ready((pred, h_out, c_out))

    pred_ref, h_ref, c_ref = decoder_forward_ref(params, tokens, hidden, cell)
    assert pred.shape == (BATCH, OUTPUT_DIM)
    assert h_out.shape == (N_LAYERS, BATCH, HID_DIM)
    assert c_out.shape == (N_LAYERS, BATCH, HID_DIM)
    # Loose tolerance: XLA's default f32 matmul precision vs the in-kernel MXU
    # path can differ slightly; real bugs show up as O(1) errors.
    assert jnp.allclose(pred, pred_ref, atol=2e-2, rtol=2e-2)
    assert jnp.allclose(h_out, h_ref, atol=2e-2, rtol=2e-2)
    assert jnp.allclose(c_out, c_ref, atol=2e-2, rtol=2e-2)

    print("KERNEL_OK")
</pallas_src>

<mosaic_0001>
module attributes {stable_mosaic.version = 11 : i64} {
  func.func @kernel(%arg0: i32, %arg1: memref<8xi32, #tpu.memory_space<smem>>, %arg2: memref<256x128xf32, #tpu.memory_space<any>>, %arg3: memref<2x8x128xf32, #tpu.memory_space<vmem>>, %arg4: memref<2x8x128xf32, #tpu.memory_space<vmem>>, %arg5: memref<128x512xf32, #tpu.memory_space<vmem>>, %arg6: memref<128x512xf32, #tpu.memory_space<vmem>>, %arg7: memref<1x512xf32, #tpu.memory_space<vmem>>, %arg8: memref<128x512xf32, #tpu.memory_space<vmem>>, %arg9: memref<128x512xf32, #tpu.memory_space<vmem>>, %arg10: memref<1x512xf32, #tpu.memory_space<vmem>>, %arg11: memref<128x128xf32, #tpu.memory_space<vmem>>, %arg12: memref<1x128xf32, #tpu.memory_space<vmem>>, %arg13: memref<8x128xf32, #tpu.memory_space<vmem>>, %arg14: memref<2x8x128xf32, #tpu.memory_space<vmem>>, %arg15: memref<2x8x128xf32, #tpu.memory_space<vmem>>, %arg16: memref<8x128xf32, #tpu.memory_space<vmem>>, %arg17: memref<8x!tpu.dma_semaphore, #tpu.memory_space<semaphore_mem>>, %arg18: memref<8x128xf32, #tpu.memory_space<vmem>>) attributes {dimension_semantics = [#tpu.dimension_semantics<arbitrary>], iteration_bounds = array<i64: 2>, scalar_prefetch = 1 : i64, scratch_operands = 3 : i64, tpu.core_type = #tpu.core_type<tc>, window_params = [{}, {pipeline_mode = #tpu.pipeline_mode<synchronous>, transform_indices = @transform_1, window_bounds = array<i64: 2, 8, 128>}, {pipeline_mode = #tpu.pipeline_mode<synchronous>, transform_indices = @transform_2, window_bounds = array<i64: 2, 8, 128>}, {pipeline_mode = #tpu.pipeline_mode<synchronous>, transform_indices = @transform_3, window_bounds = array<i64: 128, 512>}, {pipeline_mode = #tpu.pipeline_mode<synchronous>, transform_indices = @transform_4, window_bounds = array<i64: 128, 512>}, {pipeline_mode = #tpu.pipeline_mode<synchronous>, transform_indices = @transform_5, window_bounds = array<i64: 1, 512>}, {pipeline_mode = #tpu.pipeline_mode<synchronous>, transform_indices = @transform_6, window_bounds = array<i64: 128, 512>}, {pipeline_mode = #tpu.pipeline_mode<synchronous>, transform_indices = @transform_7, window_bounds = array<i64: 128, 512>}, {pipeline_mode = #tpu.pipeline_mode<synchronous>, transform_indices = @transform_8, window_bounds = array<i64: 1, 512>}, {transform_indices = @transform_9, window_bounds = array<i64: 128, 128>}, {transform_indices = @transform_10, window_bounds = array<i64: 1, 128>}, {transform_indices = @transform_11, window_bounds = array<i64: 8, 128>}, {pipeline_mode = #tpu.pipeline_mode<synchronous>, transform_indices = @transform_12, window_bounds = array<i64: 2, 8, 128>}, {pipeline_mode = #tpu.pipeline_mode<synchronous>, transform_indices = @transform_13, window_bounds = array<i64: 2, 8, 128>}]} {
    %c0_i32 = arith.constant 0 : i32
    %0 = arith.cmpi eq, %arg0, %c0_i32 : i32
    %1 = arith.extui %0 : i1 to i32
    %c0_i32_0 = arith.constant 0 : i32
    %2 = arith.cmpi ne, %1, %c0_i32_0 : i32
    scf.if %2 {
      %c0_8 = arith.constant 0 : index
      %10 = memref.load %arg1[%c0_8] : memref<8xi32, #tpu.memory_space<smem>>
      %c0_i32_9 = arith.constant 0 : i32
      %c0_i32_10 = arith.constant 0 : i32
      %11 = tpu.memref_slice %arg2[%10, %c0_i32_10] : memref<256x128xf32, #tpu.memory_space<any>> -> memref<1x128xf32, #tpu.memory_space<any>>
      %c0_i32_11 = arith.constant 0 : i32
      %c0_i32_12 = arith.constant 0 : i32
      %12 = tpu.memref_slice %arg16[%c0_i32_11, %c0_i32_12] : memref<8x128xf32, #tpu.memory_space<vmem>> -> memref<1x128xf32, #tpu.memory_space<vmem>>
      %13 = tpu.memref_slice %arg17[%c0_i32_9] : memref<8x!tpu.dma_semaphore, #tpu.memory_space<semaphore_mem>> -> memref<1x!tpu.dma_semaphore, #tpu.memory_space<semaphore_mem>>
      %14 = tpu.memref_squeeze %13 : memref<1x!tpu.dma_semaphore, #tpu.memory_space<semaphore_mem>> -> memref<!tpu.dma_semaphore, #tpu.memory_space<semaphore_mem>>
      tpu.enqueue_dma source(%11 : memref<1x128xf32, #tpu.memory_space<any>>) target(%12 : memref<1x128xf32, #tpu.memory_space<vmem>>) target_semaphore(%14 : memref<!tpu.dma_semaphore, #tpu.memory_space<semaphore_mem>>)
      %c1 = arith.constant 1 : index
      %15 = memref.load %arg1[%c1] : memref<8xi32, #tpu.memory_space<smem>>
      %c1_i32 = arith.constant 1 : i32
      %c0_i32_13 = arith.constant 0 : i32
      %16 = tpu.memref_slice %arg2[%15, %c0_i32_13] : memref<256x128xf32, #tpu.memory_space<any>> -> memref<1x128xf32, #tpu.memory_space<any>>
      %c1_i32_14 = arith.constant 1 : i32
      %c0_i32_15 = arith.constant 0 : i32
      %17 = tpu.memref_slice %arg16[%c1_i32_14, %c0_i32_15] : memref<8x128xf32, #tpu.memory_space<vmem>> -> memref<1x128xf32, #tpu.memory_space<vmem>>
      %18 = tpu.memref_slice %arg17[%c1_i32] : memref<8x!tpu.dma_semaphore, #tpu.memory_space<semaphore_mem>> -> memref<1x!tpu.dma_semaphore, #tpu.memory_space<semaphore_mem>>
      %19 = tpu.memref_squeeze %18 : memref<1x!tpu.dma_semaphore, #tpu.memory_space<semaphore_mem>> -> memref<!tpu.dma_semaphore, #tpu.memory_space<semaphore_mem>>
      tpu.enqueue_dma source(%16 : memref<1x128xf32, #tpu.memory_space<any>>) target(%17 : memref<1x128xf32, #tpu.memory_space<vmem>>) target_semaphore(%19 : memref<!tpu.dma_semaphore, #tpu.memory_space<semaphore_mem>>)
      %c2 = arith.constant 2 : index
      %20 = memref.load %arg1[%c2] : memref<8xi32, #tpu.memory_space<smem>>
      %c2_i32 = arith.constant 2 : i32
      %c0_i32_16 = arith.constant 0 : i32
      %21 = tpu.memref_slice %arg2[%20, %c0_i32_16] : memref<256x128xf32, #tpu.memory_space<any>> -> memref<1x128xf32, #tpu.memory_space<any>>
      %c2_i32_17 = arith.constant 2 : i32
      %c0_i32_18 = arith.constant 0 : i32
      %22 = tpu.memref_slice %arg16[%c2_i32_17, %c0_i32_18] : memref<8x128xf32, #tpu.memory_space<vmem>> -> memref<1x128xf32, #tpu.memory_space<vmem>>
      %23 = tpu.memref_slice %arg17[%c2_i32] : memref<8x!tpu.dma_semaphore, #tpu.memory_space<semaphore_mem>> -> memref<1x!tpu.dma_semaphore, #tpu.memory_space<semaphore_mem>>
      %24 = tpu.memref_squeeze %23 : memref<1x!tpu.dma_semaphore, #tpu.memory_space<semaphore_mem>> -> memref<!tpu.dma_semaphore, #tpu.memory_space<semaphore_mem>>
      tpu.enqueue_dma source(%21 : memref<1x128xf32, #tpu.memory_space<any>>) target(%22 : memref<1x128xf32, #tpu.memory_space<vmem>>) target_semaphore(%24 : memref<!tpu.dma_semaphore, #tpu.memory_space<semaphore_mem>>)
      %c3 = arith.constant 3 : index
      %25 = memref.load %arg1[%c3] : memref<8xi32, #tpu.memory_space<smem>>
      %c3_i32 = arith.constant 3 : i32
      %c0_i32_19 = arith.constant 0 : i32
      %26 = tpu.memref_slice %arg2[%25, %c0_i32_19] : memref<256x128xf32, #tpu.memory_space<any>> -> memref<1x128xf32, #tpu.memory_space<any>>
      %c3_i32_20 = arith.constant 3 : i32
      %c0_i32_21 = arith.constant 0 : i32
      %27 = tpu.memref_slice %arg16[%c3_i32_20, %c0_i32_21] : memref<8x128xf32, #tpu.memory_space<vmem>> -> memref<1x128xf32, #tpu.memory_space<vmem>>
      %28 = tpu.memref_slice %arg17[%c3_i32] : memref<8x!tpu.dma_semaphore, #tpu.memory_space<semaphore_mem>> -> memref<1x!tpu.dma_semaphore, #tpu.memory_space<semaphore_mem>>
      %29 = tpu.memref_squeeze %28 : memref<1x!tpu.dma_semaphore, #tpu.memory_space<semaphore_mem>> -> memref<!tpu.dma_semaphore, #tpu.memory_space<semaphore_mem>>
      tpu.enqueue_dma source(%26 : memref<1x128xf32, #tpu.memory_space<any>>) target(%27 : memref<1x128xf32, #tpu.memory_space<vmem>>) target_semaphore(%29 : memref<!tpu.dma_semaphore, #tpu.memory_space<semaphore_mem>>)
      %c4 = arith.constant 4 : index
      %30 = memref.load %arg1[%c4] : memref<8xi32, #tpu.memory_space<smem>>
      %c4_i32 = arith.constant 4 : i32
      %c0_i32_22 = arith.constant 0 : i32
      %31 = tpu.memref_slice %arg2[%30, %c0_i32_22] : memref<256x128xf32, #tpu.memory_space<any>> -> memref<1x128xf32, #tpu.memory_space<any>>
      %c4_i32_23 = arith.constant 4 : i32
      %c0_i32_24 = arith.constant 0 : i32
      %32 = tpu.memref_slice %arg16[%c4_i32_23, %c0_i32_24] : memref<8x128xf32, #tpu.memory_space<vmem>> -> memref<1x128xf32, #tpu.memory_space<vmem>>
      %33 = tpu.memref_slice %arg17[%c4_i32] : memref<8x!tpu.dma_semaphore, #tpu.memory_space<semaphore_mem>> -> memref<1x!tpu.dma_semaphore, #tpu.memory_space<semaphore_mem>>
      %34 = tpu.memref_squeeze %33 : memref<1x!tpu.dma_semaphore, #tpu.memory_space<semaphore_mem>> -> memref<!tpu.dma_semaphore, #tpu.memory_space<semaphore_mem>>
      tpu.enqueue_dma source(%31 : memref<1x128xf32, #tpu.memory_space<any>>) target(%32 : memref<1x128xf32, #tpu.memory_space<vmem>>) target_semaphore(%34 : memref<!tpu.dma_semaphore, #tpu.memory_space<semaphore_mem>>)
      %c5 = arith.constant 5 : index
      %35 = memref.load %arg1[%c5] : memref<8xi32, #tpu.memory_space<smem>>
      %c5_i32 = arith.constant 5 : i32
      %c0_i32_25 = arith.constant 0 : i32
      %36 = tpu.memref_slice %arg2[%35, %c0_i32_25] : memref<256x128xf32, #tpu.memory_space<any>> -> memref<1x128xf32, #tpu.memory_space<any>>
      %c5_i32_26 = arith.constant 5 : i32
      %c0_i32_27 = arith.constant 0 : i32
      %37 = tpu.memref_slice %arg16[%c5_i32_26, %c0_i32_27] : memref<8x128xf32, #tpu.memory_space<vmem>> -> memref<1x128xf32, #tpu.memory_space<vmem>>
      %38 = tpu.memref_slice %arg17[%c5_i32] : memref<8x!tpu.dma_semaphore, #tpu.memory_space<semaphore_mem>> -> memref<1x!tpu.dma_semaphore, #tpu.memory_space<semaphore_mem>>
      %39 = tpu.memref_squeeze %38 : memref<1x!tpu.dma_semaphore, #tpu.memory_space<semaphore_mem>> -> memref<!tpu.dma_semaphore, #tpu.memory_space<semaphore_mem>>
      tpu.enqueue_dma source(%36 : memref<1x128xf32, #tpu.memory_space<any>>) target(%37 : memref<1x128xf32, #tpu.memory_space<vmem>>) target_semaphore(%39 : memref<!tpu.dma_semaphore, #tpu.memory_space<semaphore_mem>>)
      %c6 = arith.constant 6 : index
      %40 = memref.load %arg1[%c6] : memref<8xi32, #tpu.memory_space<smem>>
      %c6_i32 = arith.constant 6 : i32
      %c0_i32_28 = arith.constant 0 : i32
      %41 = tpu.memref_slice %arg2[%40, %c0_i32_28] : memref<256x128xf32, #tpu.memory_space<any>> -> memref<1x128xf32, #tpu.memory_space<any>>
      %c6_i32_29 = arith.constant 6 : i32
      %c0_i32_30 = arith.constant 0 : i32
      %42 = tpu.memref_slice %arg16[%c6_i32_29, %c0_i32_30] : memref<8x128xf32, #tpu.memory_space<vmem>> -> memref<1x128xf32, #tpu.memory_space<vmem>>
      %43 = tpu.memref_slice %arg17[%c6_i32] : memref<8x!tpu.dma_semaphore, #tpu.memory_space<semaphore_mem>> -> memref<1x!tpu.dma_semaphore, #tpu.memory_space<semaphore_mem>>
      %44 = tpu.memref_squeeze %43 : memref<1x!tpu.dma_semaphore, #tpu.memory_space<semaphore_mem>> -> memref<!tpu.dma_semaphore, #tpu.memory_space<semaphore_mem>>
      tpu.enqueue_dma source(%41 : memref<1x128xf32, #tpu.memory_space<any>>) target(%42 : memref<1x128xf32, #tpu.memory_space<vmem>>) target_semaphore(%44 : memref<!tpu.dma_semaphore, #tpu.memory_space<semaphore_mem>>)
      %c7 = arith.constant 7 : index
      %45 = memref.load %arg1[%c7] : memref<8xi32, #tpu.memory_space<smem>>
      %c7_i32 = arith.constant 7 : i32
      %c0_i32_31 = arith.constant 0 : i32
      %46 = tpu.memref_slice %arg2[%45, %c0_i32_31] : memref<256x128xf32, #tpu.memory_space<any>> -> memref<1x128xf32, #tpu.memory_space<any>>
      %c7_i32_32 = arith.constant 7 : i32
      %c0_i32_33 = arith.constant 0 : i32
      %47 = tpu.memref_slice %arg16[%c7_i32_32, %c0_i32_33] : memref<8x128xf32, #tpu.memory_space<vmem>> -> memref<1x128xf32, #tpu.memory_space<vmem>>
      %48 = tpu.memref_slice %arg17[%c7_i32] : memref<8x!tpu.dma_semaphore, #tpu.memory_space<semaphore_mem>> -> memref<1x!tpu.dma_semaphore, #tpu.memory_space<semaphore_mem>>
      %49 = tpu.memref_squeeze %48 : memref<1x!tpu.dma_semaphore, #tpu.memory_space<semaphore_mem>> -> memref<!tpu.dma_semaphore, #tpu.memory_space<semaphore_mem>>
      tpu.enqueue_dma source(%46 : memref<1x128xf32, #tpu.memory_space<any>>) target(%47 : memref<1x128xf32, #tpu.memory_space<vmem>>) target_semaphore(%49 : memref<!tpu.dma_semaphore, #tpu.memory_space<semaphore_mem>>)
      %c0_34 = arith.constant 0 : index
      %c0_35 = arith.constant 0 : index
      %c0_36 = arith.constant 0 : index
      %50 = vector.load %arg3[%c0_34, %c0_35, %c0_36] : memref<2x8x128xf32, #tpu.memory_space<vmem>>, vector<1x8x128xf32>
      %51 = vector.shape_cast %50 : vector<1x8x128xf32> to vector<8x128xf32>
      %c0_37 = arith.constant 0 : index
      %c0_38 = arith.constant 0 : index
      %52 = vector.load %arg6[%c0_37, %c0_38] : memref<128x512xf32, #tpu.memory_space<vmem>>, vector<128x512xf32>
      %cst_39 = arith.constant dense<0.000000e+00> : vector<8x512xf32>
      %53 = tpu.matmul %51, %52, %cst_39 {dimension_numbers = #tpu.dot_dimension_numbers<[1], [0], [0], [1], [0, 0, 1, 1], [], []>} : vector<8x128xf32>, vector<128x512xf32>, vector<8x512xf32> -> vector<8x512xf32>
      %c0_40 = arith.constant 0 : index
      %c0_41 = arith.constant 0 : index
      %54 = vector.load %arg7[%c0_40, %c0_41] : memref<1x512xf32, #tpu.memory_space<vmem>>, vector<1x512xf32>
      %55 = vector.broadcast %54 : vector<1x512xf32> to vector<8x512xf32>
      %56 = arith.addf %53, %55 : vector<8x512xf32>
      %c0_i32_42 = arith.constant 0 : i32
      %c0_i32_43 = arith.constant 0 : i32
      %57 = tpu.memref_slice %arg2[%10, %c0_i32_43] : memref<256x128xf32, #tpu.memory_space<any>> -> memref<1x128xf32, #tpu.memory_space<any>>
      %c0_i32_44 = arith.constant 0 : i32
      %c0_i32_45 = arith.constant 0 : i32
      %58 = tpu.memref_slice %arg16[%c0_i32_44, %c0_i32_45] : memref<8x128xf32, #tpu.memory_space<vmem>> -> memref<1x128xf32, #tpu.memory_space<vmem>>
      %59 = tpu.memref_slice %arg17[%c0_i32_42] : memref<8x!tpu.dma_semaphore, #tpu.memory_space<semaphore_mem>> -> memref<1x!tpu.dma_semaphore, #tpu.memory_space<semaphore_mem>>
      %60 = tpu.memref_squeeze %59 : memref<1x!tpu.dma_semaphore, #tpu.memory_space<semaphore_mem>> -> memref<!tpu.dma_semaphore, #tpu.memory_space<semaphore_mem>>
      tpu.wait_dma2 semaphore(%60 : memref<!tpu.dma_semaphore, #tpu.memory_space<semaphore_mem>>) src(%57 : memref<1x128xf32, #tpu.memory_space<any>>) dst(%58 : memref<1x128xf32, #tpu.memory_space<vmem>>)
      %c1_i32_46 = arith.constant 1 : i32
      %c0_i32_47 = arith.constant 0 : i32
      %61 = tpu.memref_slice %arg2[%15, %c0_i32_47] : memref<256x128xf32, #tpu.memory_space<any>> -> memref<1x128xf32, #tpu.memory_space<any>>
      %c1_i32_48 = arith.constant 1 : i32
      %c0_i32_49 = arith.constant 0 : i32
      %62 = tpu.memref_slice %arg16[%c1_i32_48, %c0_i32_49] : memref<8x128xf32, #tpu.memory_space<vmem>> -> memref<1x128xf32, #tpu.memory_space<vmem>>
      %63 = tpu.memref_slice %arg17[%c1_i32_46] : memref<8x!tpu.dma_semaphore, #tpu.memory_space<semaphore_mem>> -> memref<1x!tpu.dma_semaphore, #tpu.memory_space<semaphore_mem>>
      %64 = tpu.memref_squeeze %63 : memref<1x!tpu.dma_semaphore, #tpu.memory_space<semaphore_mem>> -> memref<!tpu.dma_semaphore, #tpu.memory_space<semaphore_mem>>
      tpu.wait_dma2 semaphore(%64 : memref<!tpu.dma_semaphore, #tpu.memory_space<semaphore_mem>>) src(%61 : memref<1x128xf32, #tpu.memory_space<any>>) dst(%62 : memref<1x128xf32, #tpu.memory_space<vmem>>)
      %c2_i32_50 = arith.constant 2 : i32
      %c0_i32_51 = arith.constant 0 : i32
      %65 = tpu.memref_slice %arg2[%20, %c0_i32_51] : memref<256x128xf32, #tpu.memory_space<any>> -> memref<1x128xf32, #tpu.memory_space<any>>
      %c2_i32_52 = arith.constant 2 : i32
      %c0_i32_53 = arith.constant 0 : i32
      %66 = tpu.memref_slice %arg16[%c2_i32_52, %c0_i32_53] : memref<8x128xf32, #tpu.memory_space<vmem>> -> memref<1x128xf32, #tpu.memory_space<vmem>>
      %67 = tpu.memref_slice %arg17[%c2_i32_50] : memref<8x!tpu.dma_semaphore, #tpu.memory_space<semaphore_mem>> -> memref<1x!tpu.dma_semaphore, #tpu.memory_space<semaphore_mem>>
      %68 = tpu.memref_squeeze %67 : memref<1x!tpu.dma_semaphore, #tpu.memory_space<semaphore_mem>> -> memref<!tpu.dma_semaphore, #tpu.memory_space<semaphore_mem>>
      tpu.wait_dma2 semaphore(%68 : memref<!tpu.dma_semaphore, #tpu.memory_space<semaphore_mem>>) src(%65 : memref<1x128xf32, #tpu.memory_space<any>>) dst(%66 : memref<1x128xf32, #tpu.memory_space<vmem>>)
      %c3_i32_54 = arith.constant 3 : i32
      %c0_i32_55 = arith.constant 0 : i32
      %69 = tpu.memref_slice %arg2[%25, %c0_i32_55] : memref<256x128xf32, #tpu.memory_space<any>> -> memref<1x128xf32, #tpu.memory_space<any>>
      %c3_i32_56 = arith.constant 3 : i32
      %c0_i32_57 = arith.constant 0 : i32
      %70 = tpu.memref_slice %arg16[%c3_i32_56, %c0_i32_57] : memref<8x128xf32, #tpu.memory_space<vmem>> -> memref<1x128xf32, #tpu.memory_space<vmem>>
      %71 = tpu.memref_slice %arg17[%c3_i32_54] : memref<8x!tpu.dma_semaphore, #tpu.memory_space<semaphore_mem>> -> memref<1x!tpu.dma_semaphore, #tpu.memory_space<semaphore_mem>>
      %72 = tpu.memref_squeeze %71 : memref<1x!tpu.dma_semaphore, #tpu.memory_space<semaphore_mem>> -> memref<!tpu.dma_semaphore, #tpu.memory_space<semaphore_mem>>
      tpu.wait_dma2 semaphore(%72 : memref<!tpu.dma_semaphore, #tpu.memory_space<semaphore_mem>>) src(%69 : memref<1x128xf32, #tpu.memory_space<any>>) dst(%70 : memref<1x128xf32, #tpu.memory_space<vmem>>)
      %c4_i32_58 = arith.constant 4 : i32
      %c0_i32_59 = arith.constant 0 : i32
      %73 = tpu.memref_slice %arg2[%30, %c0_i32_59] : memref<256x128xf32, #tpu.memory_space<any>> -> memref<1x128xf32, #tpu.memory_space<any>>
      %c4_i32_60 = arith.constant 4 : i32
      %c0_i32_61 = arith.constant 0 : i32
      %74 = tpu.memref_slice %arg16[%c4_i32_60, %c0_i32_61] : memref<8x128xf32, #tpu.memory_space<vmem>> -> memref<1x128xf32, #tpu.memory_space<vmem>>
      %75 = tpu.memref_slice %arg17[%c4_i32_58] : memref<8x!tpu.dma_semaphore, #tpu.memory_space<semaphore_mem>> -> memref<1x!tpu.dma_semaphore, #tpu.memory_space<semaphore_mem>>
      %76 = tpu.memref_squeeze %75 : memref<1x!tpu.dma_semaphore, #tpu.memory_space<semaphore_mem>> -> memref<!tpu.dma_semaphore, #tpu.memory_space<semaphore_mem>>
      tpu.wait_dma2 semaphore(%76 : memref<!tpu.dma_semaphore, #tpu.memory_space<semaphore_mem>>) src(%73 : memref<1x128xf32, #tpu.memory_space<any>>) dst(%74 : memref<1x128xf32, #tpu.memory_space<vmem>>)
      %c5_i32_62 = arith.constant 5 : i32
      %c0_i32_63 = arith.constant 0 : i32
      %77 = tpu.memref_slice %arg2[%35, %c0_i32_63] : memref<256x128xf32, #tpu.memory_space<any>> -> memref<1x128xf32, #tpu.memory_space<any>>
      %c5_i32_64 = arith.constant 5 : i32
      %c0_i32_65 = arith.constant 0 : i32
      %78 = tpu.memref_slice %arg16[%c5_i32_64, %c0_i32_65] : memref<8x128xf32, #tpu.memory_space<vmem>> -> memref<1x128xf32, #tpu.memory_space<vmem>>
      %79 = tpu.memref_slice %arg17[%c5_i32_62] : memref<8x!tpu.dma_semaphore, #tpu.memory_space<semaphore_mem>> -> memref<1x!tpu.dma_semaphore, #tpu.memory_space<semaphore_mem>>
      %80 = tpu.memref_squeeze %79 : memref<1x!tpu.dma_semaphore, #tpu.memory_space<semaphore_mem>> -> memref<!tpu.dma_semaphore, #tpu.memory_space<semaphore_mem>>
      tpu.wait_dma2 semaphore(%80 : memref<!tpu.dma_semaphore, #tpu.memory_space<semaphore_mem>>) src(%77 : memref<1x128xf32, #tpu.memory_space<any>>) dst(%78 : memref<1x128xf32, #tpu.memory_space<vmem>>)
      %c6_i32_66 = arith.constant 6 : i32
      %c0_i32_67 = arith.constant 0 : i32
      %81 = tpu.memref_slice %arg2[%40, %c0_i32_67] : memref<256x128xf32, #tpu.memory_space<any>> -> memref<1x128xf32, #tpu.memory_space<any>>
      %c6_i32_68 = arith.constant 6 : i32
      %c0_i32_69 = arith.constant 0 : i32
      %82 = tpu.memref_slice %arg16[%c6_i32_68, %c0_i32_69] : memref<8x128xf32, #tpu.memory_space<vmem>> -> memref<1x128xf32, #tpu.memory_space<vmem>>
      %83 = tpu.memref_slice %arg17[%c6_i32_66] : memref<8x!tpu.dma_semaphore, #tpu.memory_space<semaphore_mem>> -> memref<1x!tpu.dma_semaphore, #tpu.memory_space<semaphore_mem>>
      %84 = tpu.memref_squeeze %83 : memref<1x!tpu.dma_semaphore, #tpu.memory_space<semaphore_mem>> -> memref<!tpu.dma_semaphore, #tpu.memory_space<semaphore_mem>>
      tpu.wait_dma2 semaphore(%84 : memref<!tpu.dma_semaphore, #tpu.memory_space<semaphore_mem>>) src(%81 : memref<1x128xf32, #tpu.memory_space<any>>) dst(%82 : memref<1x128xf32, #tpu.memory_space<vmem>>)
      %c7_i32_70 = arith.constant 7 : i32
      %c0_i32_71 = arith.constant 0 : i32
      %85 = tpu.memref_slice %arg2[%45, %c0_i32_71] : memref<256x128xf32, #tpu.memory_space<any>> -> memref<1x128xf32, #tpu.memory_space<any>>
      %c7_i32_72 = arith.constant 7 : i32
      %c0_i32_73 = arith.constant 0 : i32
      %86 = tpu.memref_slice %arg16[%c7_i32_72, %c0_i32_73] : memref<8x128xf32, #tpu.memory_space<vmem>> -> memref<1x128xf32, #tpu.memory_space<vmem>>
      %87 = tpu.memref_slice %arg17[%c7_i32_70] : memref<8x!tpu.dma_semaphore, #tpu.memory_space<semaphore_mem>> -> memref<1x!tpu.dma_semaphore, #tpu.memory_space<semaphore_mem>>
      %88 = tpu.memref_squeeze %87 : memref<1x!tpu.dma_semaphore, #tpu.memory_space<semaphore_mem>> -> memref<!tpu.dma_semaphore, #tpu.memory_space<semaphore_mem>>
      tpu.wait_dma2 semaphore(%88 : memref<!tpu.dma_semaphore, #tpu.memory_space<semaphore_mem>>) src(%85 : memref<1x128xf32, #tpu.memory_space<any>>) dst(%86 : memref<1x128xf32, #tpu.memory_space<vmem>>)
      %c0_74 = arith.constant 0 : index
      %c0_75 = arith.constant 0 : index
      %89 = vector.load %arg16[%c0_74, %c0_75] : memref<8x128xf32, #tpu.memory_space<vmem>>, vector<8x128xf32>
      %c0_76 = arith.constant 0 : index
      %c0_77 = arith.constant 0 : index
      %90 = vector.load %arg5[%c0_76, %c0_77] : memref<128x512xf32, #tpu.memory_space<vmem>>, vector<128x512xf32>
      %cst_78 = arith.constant dense<0.000000e+00> : vector<8x512xf32>
      %91 = tpu.matmul %89, %90, %cst_78 {dimension_numbers = #tpu.dot_dimension_numbers<[1], [0], [0], [1], [0, 0, 1, 1], [], []>} : vector<8x128xf32>, vector<128x512xf32>, vector<8x512xf32> -> vector<8x512xf32>
      %92 = arith.addf %91, %56 : vector<8x512xf32>
      %93 = vector.extract_strided_slice %92 {offsets = [0, 0], sizes = [8, 128], strides = [1, 1]} : vector<8x512xf32> to vector<8x128xf32>
      %94 = arith.negf %93 : vector<8x128xf32>
      %95 = math.exp %94 : vector<8x128xf32>
      %cst_79 = arith.constant 1.000000e+00 : f32
      %96 = vector.broadcast %cst_79 : f32 to vector<8x128xf32>
      %97 = arith.addf %96, %95 : vector<8x128xf32>
      %98 = arith.divf %96, %97 : vector<8x128xf32>
      %99 = vector.extract_strided_slice %92 {offsets = [0, 128], sizes = [8, 128], strides = [1, 1]} : vector<8x512xf32> to vector<8x128xf32>
      %100 = arith.negf %99 : vector<8x128xf32>
      %101 = math.exp %100 : vector<8x128xf32>
      %cst_80 = arith.constant 1.000000e+00 : f32
      %102 = vector.broadcast %cst_80 : f32 to vector<8x128xf32>
      %103 = arith.addf %102, %101 : vector<8x128xf32>
      %104 = arith.divf %102, %103 : vector<8x128xf32>
      %105 = vector.extract_strided_slice %92 {offsets = [0, 256], sizes = [8, 128], strides = [1, 1]} : vector<8x512xf32> to vector<8x128xf32>
      %106 = math.tanh %105 : vector<8x128xf32>
      %107 = vector.extract_strided_slice %92 {offsets = [0, 384], sizes = [8, 128], strides = [1, 1]} : vector<8x512xf32> to vector<8x128xf32>
      %108 = arith.negf %107 : vector<8x128xf32>
      %109 = math.exp %108 : vector<8x128xf32>
      %cst_81 = arith.constant 1.000000e+00 : f32
      %110 = vector.broadcast %cst_81 : f32 to vector<8x128xf32>
      %111 = arith.addf %110, %109 : vector<8x128xf32>
      %112 = arith.divf %110, %111 : vector<8x128xf32>
      %c0_82 = arith.constant 0 : index
      %c0_83 = arith.constant 0 : index
      %c0_84 = arith.constant 0 : index
      %113 = vector.load %arg4[%c0_82, %c0_83, %c0_84] : memref<2x8x128xf32, #tpu.memory_space<vmem>>, vector<1x8x128xf32>
      %114 = vector.shape_cast %113 : vector<1x8x128xf32> to vector<8x128xf32>
      %115 = arith.mulf %104, %114 : vector<8x128xf32>
      %116 = arith.mulf %98, %106 : vector<8x128xf32>
      %117 = arith.addf %115, %116 : vector<8x128xf32>
      %118 = math.tanh %117 : vector<8x128xf32>
      %119 = arith.mulf %112, %118 : vector<8x128xf32>
      %c0_85 = arith.constant 0 : index
      %c0_86 = arith.constant 0 : index
      %c0_87 = arith.constant 0 : index
      %120 = vector.load %arg14[%c0_85, %c0_86, %c0_87] : memref<2x8x128xf32, #tpu.memory_space<vmem>>, vector<1x8x128xf32>
      %121 = vector.shape_cast %120 : vector<1x8x128xf32> to vector<8x128xf32>
      %122 = vector.shape_cast %119 : vector<8x128xf32> to vector<1x8x128xf32>
      tpu.vector_store %arg14[%c0_85, %c0_86, %c0_87], %122 {strides = array<i32>} : memref<2x8x128xf32, #tpu.memory_space<vmem>>, vector<1x8x128xf32>,
      %c0_88 = arith.constant 0 : index
      %c0_89 = arith.constant 0 : index
      %c0_90 = arith.constant 0 : index
      %123 = vector.load %arg15[%c0_88, %c0_89, %c0_90] : memref<2x8x128xf32, #tpu.memory_space<vmem>>, vector<1x8x128xf32>
      %124 = vector.shape_cast %123 : vector<1x8x128xf32> to vector<8x128xf32>
      %125 = vector.shape_cast %117 : vector<8x128xf32> to vector<1x8x128xf32>
      tpu.vector_store %arg15[%c0_88, %c0_89, %c0_90], %125 {strides = array<i32>} : memref<2x8x128xf32, #tpu.memory_space<vmem>>, vector<1x8x128xf32>,
      %c0_91 = arith.constant 0 : index
      %c0_92 = arith.constant 0 : index
      %126 = vector.load %arg8[%c0_91, %c0_92] : memref<128x512xf32, #tpu.memory_space<vmem>>, vector<128x512xf32>
      %cst_93 = arith.constant dense<0.000000e+00> : vector<8x512xf32>
      %127 = tpu.matmul %119, %126, %cst_93 {dimension_numbers = #tpu.dot_dimension_numbers<[1], [0], [0], [1], [0, 0, 1, 1], [], []>} : vector<8x128xf32>, vector<128x512xf32>, vector<8x512xf32> -> vector<8x512xf32>
      %c1_94 = arith.constant 1 : index
      %c0_95 = arith.constant 0 : index
      %c0_96 = arith.constant 0 : index
      %128 = vector.load %arg3[%c1_94, %c0_95, %c0_96] : memref<2x8x128xf32, #tpu.memory_space<vmem>>, vector<1x8x128xf32>
      %129 = vector.shape_cast %128 : vector<1x8x128xf32> to vector<8x128xf32>
      %c0_97 = arith.constant 0 : index
      %c0_98 = arith.constant 0 : index
      %130 = vector.load %arg9[%c0_97, %c0_98] : memref<128x512xf32, #tpu.memory_space<vmem>>, vector<128x512xf32>
      %cst_99 = arith.constant dense<0.000000e+00> : vector<8x512xf32>
      %131 = tpu.matmul %129, %130, %cst_99 {dimension_numbers = #tpu.dot_dimension_numbers<[1], [0], [0], [1], [0, 0, 1, 1], [], []>} : vector<8x128xf32>, vector<128x512xf32>, vector<8x512xf32> -> vector<8x512xf32>
      %132 = arith.addf %127, %131 : vector<8x512xf32>
      %c0_100 = arith.constant 0 : index
      %c0_101 = arith.constant 0 : index
      %133 = vector.load %arg10[%c0_100, %c0_101] : memref<1x512xf32, #tpu.memory_space<vmem>>, vector<1x512xf32>
      %134 = vector.broadcast %133 : vector<1x512xf32> to vector<8x512xf32>
      %135 = arith.addf %132, %134 : vector<8x512xf32>
      %136 = vector.extract_strided_slice %135 {offsets = [0, 0], sizes = [8, 128], strides = [1, 1]} : vector<8x512xf32> to vector<8x128xf32>
      %137 = arith.negf %136 : vector<8x128xf32>
      %138 = math.exp %137 : vector<8x128xf32>
      %cst_102 = arith.constant 1.000000e+00 : f32
      %139 = vector.broadcast %cst_102 : f32 to vector<8x128xf32>
      %140 = arith.addf %139, %138 : vector<8x128xf32>
      %141 = arith.divf %139, %140 : vector<8x128xf32>
      %142 = vector.extract_strided_slice %135 {offsets = [0, 128], sizes = [8, 128], strides = [1, 1]} : vector<8x512xf32> to vector<8x128xf32>
      %143 = arith.negf %142 : vector<8x128xf32>
      %144 = math.exp %143 : vector<8x128xf32>
      %cst_103 = arith.constant 1.000000e+00 : f32
      %145 = vector.broadcast %cst_103 : f32 to vector<8x128xf32>
      %146 = arith.addf %145, %144 : vector<8x128xf32>
      %147 = arith.divf %145, %146 : vector<8x128xf32>
      %148 = vector.extract_strided_slice %135 {offsets = [0, 256], sizes = [8, 128], strides = [1, 1]} : vector<8x512xf32> to vector<8x128xf32>
      %149 = math.tanh %148 : vector<8x128xf32>
      %150 = vector.extract_strided_slice %135 {offsets = [0, 384], sizes = [8, 128], strides = [1, 1]} : vector<8x512xf32> to vector<8x128xf32>
      %151 = arith.negf %150 : vector<8x128xf32>
      %152 = math.exp %151 : vector<8x128xf32>
      %cst_104 = arith.constant 1.000000e+00 : f32
      %153 = vector.broadcast %cst_104 : f32 to vector<8x128xf32>
      %154 = arith.addf %153, %152 : vector<8x128xf32>
      %155 = arith.divf %153, %154 : vector<8x128xf32>
      %c1_105 = arith.constant 1 : index
      %c0_106 = arith.constant 0 : index
      %c0_107 = arith.constant 0 : index
      %156 = vector.load %arg4[%c1_105, %c0_106, %c0_107] : memref<2x8x128xf32, #tpu.memory_space<vmem>>, vector<1x8x128xf32>
      %157 = vector.shape_cast %156 : vector<1x8x128xf32> to vector<8x128xf32>
      %158 = arith.mulf %147, %157 : vector<8x128xf32>
      %159 = arith.mulf %141, %149 : vector<8x128xf32>
      %160 = arith.addf %158, %159 : vector<8x128xf32>
      %161 = math.tanh %160 : vector<8x128xf32>
      %162 = arith.mulf %155, %161 : vector<8x128xf32>
      %c1_108 = arith.constant 1 : index
      %c0_109 = arith.constant 0 : index
      %c0_110 = arith.constant 0 : index
      %163 = vector.load %arg14[%c1_108, %c0_109, %c0_110] : memref<2x8x128xf32, #tpu.memory_space<vmem>>, vector<1x8x128xf32>
      %164 = vector.shape_cast %163 : vector<1x8x128xf32> to vector<8x128xf32>
      %165 = vector.shape_cast %162 : vector<8x128xf32> to vector<1x8x128xf32>
      tpu.vector_store %arg14[%c1_108, %c0_109, %c0_110], %165 {strides = array<i32>} : memref<2x8x128xf32, #tpu.memory_space<vmem>>, vector<1x8x128xf32>,
      %c1_111 = arith.constant 1 : index
      %c0_112 = arith.constant 0 : index
      %c0_113 = arith.constant 0 : index
      %166 = vector.load %arg15[%c1_111, %c0_112, %c0_113] : memref<2x8x128xf32, #tpu.memory_space<vmem>>, vector<1x8x128xf32>
      %167 = vector.shape_cast %166 : vector<1x8x128xf32> to vector<8x128xf32>
      %168 = vector.shape_cast %160 : vector<8x128xf32> to vector<1x8x128xf32>
      tpu.vector_store %arg15[%c1_111, %c0_112, %c0_113], %168 {strides = array<i32>} : memref<2x8x128xf32, #tpu.memory_space<vmem>>, vector<1x8x128xf32>,
      %c0_114 = arith.constant 0 : index
      %c0_115 = arith.constant 0 : index
      %169 = vector.load %arg18[%c0_114, %c0_115] : memref<8x128xf32, #tpu.memory_space<vmem>>, vector<8x128xf32>
      tpu.vector_store %arg18[%c0_114, %c0_115], %162 {strides = array<i32>} : memref<8x128xf32, #tpu.memory_space<vmem>>, vector<8x128xf32>,
    } else {
    }
    %c0 = arith.constant 0 : index
    %c0_1 = arith.constant 0 : index
    %3 = vector.load %arg18[%c0, %c0_1] : memref<8x128xf32, #tpu.memory_space<vmem>>, vector<8x128xf32>
    %c0_2 = arith.constant 0 : index
    %c0_3 = arith.constant 0 : index
    %4 = vector.load %arg11[%c0_2, %c0_3] : memref<128x128xf32, #tpu.memory_space<vmem>>, vector<128x128xf32>
    %cst = arith.constant dense<0.000000e+00> : vector<8x128xf32>
    %5 = tpu.matmul %3, %4, %cst {dimension_numbers = #tpu.dot_dimension_numbers<[1], [0], [0], [1], [0, 0, 1, 1], [], []>} : vector<8x128xf32>, vector<128x128xf32>, vector<8x128xf32> -> vector<8x128xf32>
    %c0_4 = arith.constant 0 : index
    %c0_5 = arith.constant 0 : index
    %6 = vector.load %arg12[%c0_4, %c0_5] : memref<1x128xf32, #tpu.memory_space<vmem>>, vector<1x128xf32>
    %7 = vector.broadcast %6 : vector<1x128xf32> to vector<8x128xf32>
    %8 = arith.addf %5, %7 : vector<8x128xf32>
    %c0_6 = arith.constant 0 : index
    %c0_7 = arith.constant 0 : index
    %9 = vector.load %arg13[%c0_6, %c0_7] : memref<8x128xf32, #tpu.memory_space<vmem>>, vector<8x128xf32>
    tpu.vector_store %arg13[%c0_6, %c0_7], %8 {strides = array<i32>} : memref<8x128xf32, #tpu.memory_space<vmem>>, vector<8x128xf32>,
    return
  }
  func.func @transform_1(%arg0: i32, %arg1: memref<8xi32, #tpu.memory_space<smem>>) -> (i32, i32, i32) {
    %c0_i32 = arith.constant 0 : i32
    %c0_i32_0 = arith.constant 0 : i32
    %c0_i32_1 = arith.constant 0 : i32
    %c0_i32_2 = arith.constant 0 : i32
    return %c0_i32, %c0_i32_0, %c0_i32_1 : i32, i32, i32
  }
  func.func @transform_2(%arg0: i32, %arg1: memref<8xi32, #tpu.memory_space<smem>>) -> (i32, i32, i32) {
    %c0_i32 = arith.constant 0 : i32
    %c0_i32_0 = arith.constant 0 : i32
    %c0_i32_1 = arith.constant 0 : i32
    %c0_i32_2 = arith.constant 0 : i32
    return %c0_i32, %c0_i32_0, %c0_i32_1 : i32, i32, i32
  }
  func.func @transform_3(%arg0: i32, %arg1: memref<8xi32, #tpu.memory_space<smem>>) -> (i32, i32) {
    %c0_i32 = arith.constant 0 : i32
    %c0_i32_0 = arith.constant 0 : i32
    %c0_i32_1 = arith.constant 0 : i32
    return %c0_i32, %c0_i32_0 : i32, i32
  }
  func.func @transform_4(%arg0: i32, %arg1: memref<8xi32, #tpu.memory_space<smem>>) -> (i32, i32) {
    %c0_i32 = arith.constant 0 : i32
    %c0_i32_0 = arith.constant 0 : i32
    %c0_i32_1 = arith.constant 0 : i32
    return %c0_i32, %c0_i32_0 : i32, i32
  }
  func.func @transform_5(%arg0: i32, %arg1: memref<8xi32, #tpu.memory_space<smem>>) -> (i32, i32) {
    %c0_i32 = arith.constant 0 : i32
    %c0_i32_0 = arith.constant 0 : i32
    %c0_i32_1 = arith.constant 0 : i32
    return %c0_i32, %c0_i32_0 : i32, i32
  }
  func.func @transform_6(%arg0: i32, %arg1: memref<8xi32, #tpu.memory_space<smem>>) -> (i32, i32) {
    %c0_i32 = arith.constant 0 : i32
    %c0_i32_0 = arith.constant 0 : i32
    %c0_i32_1 = arith.constant 0 : i32
    return %c0_i32, %c0_i32_0 : i32, i32
  }
  func.func @transform_7(%arg0: i32, %arg1: memref<8xi32, #tpu.memory_space<smem>>) -> (i32, i32) {
    %c0_i32 = arith.constant 0 : i32
    %c0_i32_0 = arith.constant 0 : i32
    %c0_i32_1 = arith.constant 0 : i32
    return %c0_i32, %c0_i32_0 : i32, i32
  }
  func.func @transform_8(%arg0: i32, %arg1: memref<8xi32, #tpu.memory_space<smem>>) -> (i32, i32) {
    %c0_i32 = arith.constant 0 : i32
    %c0_i32_0 = arith.constant 0 : i32
    %c0_i32_1 = arith.constant 0 : i32
    return %c0_i32, %c0_i32_0 : i32, i32
  }
  func.func @transform_9(%arg0: i32, %arg1: memref<8xi32, #tpu.memory_space<smem>>) -> (i32, i32) {
    %c0_i32 = arith.constant 0 : i32
    %c0_i32_0 = arith.constant 0 : i32
    return %c0_i32, %arg0 : i32, i32
  }
  func.func @transform_10(%arg0: i32, %arg1: memref<8xi32, #tpu.memory_space<smem>>) -> (i32, i32) {
    %c0_i32 = arith.constant 0 : i32
    %c0_i32_0 = arith.constant 0 : i32
    return %c0_i32, %arg0 : i32, i32
  }
  func.func @transform_11(%arg0: i32, %arg1: memref<8xi32, #tpu.memory_space<smem>>) -> (i32, i32) {
    %c0_i32 = arith.constant 0 : i32
    %c0_i32_0 = arith.constant 0 : i32
    return %c0_i32, %arg0 : i32, i32
  }
  func.func @transform_12(%arg0: i32, %arg1: memref<8xi32, #tpu.memory_space<smem>>) -> (i32, i32, i32) {
    %c0_i32 = arith.constant 0 : i32
    %c0_i32_0 = arith.constant 0 : i32
    %c0_i32_1 = arith.constant 0 : i32
    %c0_i32_2 = arith.constant 0 : i32
    return %c0_i32, %c0_i32_0, %c0_i32_1 : i32, i32, i32
  }
  func.func @transform_13(%arg0: i32, %arg1: memref<8xi32, #tpu.memory_space<smem>>) -> (i32, i32, i32) {
    %c0_i32 = arith.constant 0 : i32
    %c0_i32_0 = arith.constant 0 : i32
    %c0_i32_1 = arith.constant 0 : i32
    %c0_i32_2 = arith.constant 0 : i32
    return %c0_i32, %c0_i32_0, %c0_i32_1 : i32, i32, i32
  }
}

</mosaic_0001>

<bundles_post_ra>
// kernel: decoder_forward_pallas.1
= control target key start
LH: loop header
LB: loop body
LE: loop exit
PB: predicated region body
PF: predicated region fallthrough
CT: control target
= control target key end

     0   :  { %s3909_s0 = inlined_call_operand.vmem [shape: s32[8], index: 0, kind: input, shape index: {}]   ;;  %s3910_s1 = inlined_call_operand.hbm [shape: f32[256,128], index: 1, kind: input, shape index: {}]   ;;  %s3911_s2 = inlined_call_operand.hbm [shape: f32[2,8,128], index: 2, kind: input, shape index: {}, may-alias: {2,13}]   ;;  %s3912_s3 = inlined_call_operand.hbm [shape: f32[2,8,128], index: 3, kind: input, shape index: {}, may-alias: {3,14}]   ;;  %s3913_s4 = inlined_call_operand.hbm [shape: f32[128,512], index: 4, kind: input, shape index: {}]   ;;  %s3914_s5 = inlined_call_operand.hbm [shape: f32[128,512], index: 5, kind: input, shape index: {}]   ;;  %s3915_s6 = inlined_call_operand.vmem [shape: f32[1,512], index: 6, kind: input, shape index: {}]   ;;  %s3916_s7 = inlined_call_operand.hbm [shape: f32[128,512], index: 7, kind: input, shape index: {}]   ;;  %s3917_s8 = inlined_call_operand.hbm [shape: f32[128,512], index: 8, kind: input, shape index: {}]   ;;  %s3918_s9 = inlined_call_operand.vmem [shape: f32[1,512], index: 9, kind: input, shape index: {}]   ;;  %s3919_s10 = inlined_call_operand.hbm [shape: f32[128,256], index: 10, kind: input, shape index: {}]   ;;  %s3920_s11 = inlined_call_operand.vmem [shape: f32[1,256], index: 11, kind: input, shape index: {}]   ;;  %s3921_s12 = inlined_call_operand.hbm [shape: f32[8,256], index: 12, kind: output, shape index: {0}]   ;;  %s3922_s13 = inlined_call_operand.hbm [shape: f32[2,8,128], index: 13, kind: output, shape index: {1}, may-alias: {2,13}]   ;;  %s3923_s14 = inlined_call_operand.hbm [shape: f32[2,8,128], index: 14, kind: output, shape index: {2}, may-alias: {3,14}]  }
   0x1   :  { %3934 = sst [smem:[#allocation57_spill]] %s3910_s1  ;;  %s20_s15 = sshll.u32 %s3909_s0, 4  ;;  %s21_s15 = int_to_ptr.vmem [resolvable:$true] %s20_s15 }
   0x2   :  { %3935 = sst [smem:[#allocation58_spill]] %s3911_s2  ;;  %s2554_s16 = scalar_lea.vmem %s21_s15, 16 }
   0x3   :  { %3936 = sst [smem:[#allocation59_spill]] %s3912_s3  ;;  %p2555_p0 = scmp.ne.s32.totalorder %s21_s15, %s2554_s16 }
   0x4   :  { %3937 = sst [smem:[#allocation60_spill]] %s3913_s4  ;;  %p2559_p1 = scmp.lt.s32.totalorder %s21_s15, %s21_s15 }
   0x5   :  { %3938 = sst [smem:[#allocation61_spill]] %s3914_s5  ;;  %p2560_p2 = scmp.lt.s32.totalorder %s2554_s16, %s2554_s16 }
   0x6   :  { %3939 = sst [smem:[#allocation62_spill]] %s3915_s6 }
   0x7   :  { %3940 = sst [smem:[#allocation63_spill]] %s3916_s7  ;;  %p2561_p3 = por %p2560_p2, %p2559_p1 }
   0x8   :  { %3941 = sst [smem:[#allocation64_spill]] %s3917_s8 }
   0x9   :  { %3942 = sst [smem:[#allocation65_spill]] %s3918_s9  ;;  %p2562_p4 = pnand %p2561_p3, %p2555_p0 }
   0xa   :  { %3943 = sst [smem:[#allocation66_spill]] %s3919_s10 }
   0xb   :  { %3944 = sst [smem:[#allocation67_spill]] %s3921_s12 }
   0xc   :  { %3945 = sst [smem:[#allocation68_spill]] %s3922_s13 }
   0xd   :  { %3946 = sst [smem:[#allocation69_spill]] %s3923_s14 }
   0xe   :  { %2565 = shalt.err (!%p2562_p4)  }
   0xf   :  { %s3114_s17 = smov [#allocation6]  }
  0x10   :  { %23 = dma.vmem_to_smem %s21_s15, 16, %s3114_s17, [#allocation5] }
  0x11   :  { %3052 = dma.done.wait [#allocation5], 16 }
  0x12   :  { %3053 = vsyncadd [#allocation5], 4294967280 }
  0x13   :  { %25 = sfence }
  0x14   :  { %26 = vsyncpa [#allocation8], 0 }
  0x15   :  { %27 = vsyncpa [#allocation11], 0 }
  0x16   :  { %28 = vsyncpa [#allocation14], 0 }
  0x17   :  { %29 = vsyncpa [#allocation17], 0 }
  0x18   :  { %30 = vsyncpa [#allocation9], 0 }
  0x19   :  { %32 = vsyncpa [#allocation9 + $0x1], 0 }
  0x1a   :  { %33 = vsyncpa [#allocation21], 0  ;;  %s3222_s0 = smov 0   ;;  %s3224_s18 = smov 0  }
  0x1b   :  { %s3226_s19 = smov 0   ;;  %s3228_s20 = smov 0  }
  0x1c LB: > { %s3115_s21 = smov [#allocation7]   ;;  %s3243_s23 = sadd.s32 4294967295, %s3112_s20   ;;  %s3112_s20 = sphi %s3228_s20, %s3996_s20   ;;  %s3108_s19 = sphi %s3226_s19, %s3995_s19   ;;  %s3104_s18 = sphi %s3224_s18, %s3994_s18   ;;  %s3100_s0 = sphi %s3222_s0, %s3993_s0  }
  0x1d   : > { %s344_s22 = sshll.u32 %s3115_s21, 4  ;;  %p1979_p5 = scmp.ge.s32.totalorder %s3112_s20, 1  ;;  %s3249_s22 = int_to_ptr.vmem [resolvable:$true] %s344_s22 }
  0x1e   : > { %p3928_p6 = scmp.eq.s32.totalorder %s3243_s23, 0  ;;  %p332_p7 = scmp.lt.s32.totalorder %s3112_s20, 3 }
  0x1f   : > { %s3116_s25 = smov [#allocation10]   ;;  %s3117_s28 = smov [#allocation13]  }
  0x20   : > { %p3251_p9 = pnand %p1979_p5, %p332_p7  ;;  %s357_s26 = sshll.u32 %s3116_s25, 4  ;;  %s3264_s26 = int_to_ptr.vmem [resolvable:$true] %s357_s26 }
  0x21   : > { %s3266_s29 = sshll.u32 %s3117_s28, 4  ;;  %s3949_s2 = sld [smem:[#allocation58_spill]]  ;;  %s384_s29 = int_to_ptr.vmem [resolvable:$true] %s3266_s29 }
  0x22   : > { %s3947_s24 = scalar_select %p3251_p9, 1, 0 }
  0x23   : > { %p2417_p11 = pneg %p3251_p9 }
  0x25   : > { %p3260_p12 = pnand %p2417_p11, %p3928_p6 }
  0x27   : > { %s2566_s16 = scalar_lea.hbm %s3949_s2, 256  ;;  %p3276_p0 = pneg %p3260_p12 }
  0x28   : > { %p2567_p13 = scmp.ne.s32.totalorder %s3949_s2, %s2566_s16  ;;  %p2573_p3 = scmp.lt.u32.totalorder %s2566_s16, %s3949_s2 }
  0x2a   : > { %p2569_p1 = pnand %p3276_p0, %p2567_p13 }
  0x2c   : > { %p2570_p2 = pneg %p2569_p1 }
  0x2e   : > { %p2575_p4 = pnand %p2573_p3, %p2570_p2 }
  0x30   : > { %2578 = shalt.err (!%p2575_p4)
}
  0x31   : > { %s2579_s30 = scalar_lea.vmem %s3249_s22, 256  ;;  %p2587_p10 = scmp.lt.s32.totalorder %s3249_s22, %s3249_s22 }
  0x32   : > { %p2580_p5 = scmp.ne.s32.totalorder %s3249_s22, %s2579_s30  ;;  %p2588_p8 = scmp.lt.s32.totalorder %s2579_s30, %s2579_s30 }
  0x34   : > { %p2582_p7 = pnand %p2580_p5, %p3276_p0  ;;  %p2589_p13 = por %p2588_p8, %p2587_p10 }
  0x36   : > { %p2583_p11 = pneg %p2582_p7 }
  0x38   : > { %p2590_p1 = pnand %p2589_p13, %p2583_p11 }
  0x3a   : > { %2593 = shalt.err (!%p2590_p1)
}
  0x3b   : > { %s3930_s15 = smov 128   ;;  %s3931_s12 = smov 8  }
  0x3c   : > { %2420 = dma.hbm_to_vmem [thread:$0]  (!%p3260_p12), %s3949_s2, 256, %s3249_s22, [#allocation8], %s3930_s15, %s3930_s15, %s3931_s12  }
  0x3d   : > { %s3951_s3 = sld [smem:[#allocation59_spill]] }
  0x43   : > { %s2594_s30 = scalar_lea.hbm %s3951_s3, 256 }
  0x44   : > { %p2595_p8 = scmp.ne.s32.totalorder %s3951_s3, %s2594_s30  ;;  %p2601_p3 = scmp.lt.u32.totalorder %s2594_s30, %s3951_s3 }
  0x46   : > { %p2597_p10 = pnand %p2595_p8, %p3276_p0 }
  0x48   : > { %p2598_p2 = pneg %p2597_p10 }
  0x4a   : > { %p2603_p4 = pnand %p2601_p3, %p2598_p2 }
  0x4c   : > { %2606 = shalt.err (!%p2603_p4)
}
  0x4d   : > { %s2607_s22 = scalar_lea.vmem %s3264_s26, 256  ;;  %p2615_p13 = scmp.lt.s32.totalorder %s3264_s26, %s3264_s26 }
  0x4e   : > { %p2608_p5 = scmp.ne.s32.totalorder %s3264_s26, %s2607_s22  ;;  %p2616_p1 = scmp.lt.s32.totalorder %s2607_s22, %s2607_s22 }
  0x50   : > { %p2610_p7 = pnand %p2608_p5, %p3276_p0  ;;  %p2617_p8 = por %p2616_p1, %p2615_p13 }
  0x52   : > { %p2611_p11 = pneg %p2610_p7 }
  0x54   : > { %p2618_p10 = pnand %p2617_p8, %p2611_p11 }
  0x56   : > { %2621 = shalt.err (!%p2618_p10)
}
  0x57   : > { %2423 = dma.hbm_to_vmem [thread:$0]  (!%p3260_p12), %s3951_s3, 256, %s3264_s26, [#allocation11], %s3930_s15, %s3930_s15, %s3931_s12  }
  0x58   : > { %s3952_s5 = sld [smem:[#allocation61_spill]] }
  0x5e   : > { %s2622_s16 = scalar_lea.hbm %s3952_s5, 8192 }
  0x5f   : > { %p2623_p2 = scmp.ne.s32.totalorder %s3952_s5, %s2622_s16  ;;  %p2629_p5 = scmp.lt.u32.totalorder %s2622_s16, %s3952_s5 }
  0x61   : > { %p2625_p3 = pnand %p2623_p2, %p3276_p0 }
  0x63   : > { %p2626_p4 = pneg %p2625_p3 }
  0x65   : > { %p2631_p7 = pnand %p2629_p5, %p2626_p4 }
  0x67   : > { %2634 = shalt.err (!%p2631_p7)
}
  0x68   : > { %s2635_s22 = scalar_lea.vmem %s384_s29, 8192  ;;  %p2643_p8 = scmp.lt.s32.totalorder %s384_s29, %s384_s29 }
  0x69   : > { %p2636_p11 = scmp.ne.s32.totalorder %s384_s29, %s2635_s22  ;;  %p2644_p10 = scmp.lt.s32.totalorder %s2635_s22, %s2635_s22 }
  0x6b   : > { %p2638_p13 = pnand %p2636_p11, %p3276_p0  ;;  %p2645_p6 = por %p2644_p10, %p2643_p8 }
  0x6d   : > { %p2639_p1 = pneg %p2638_p13 }
  0x6f   : > { %p2646_p9 = pnand %p2645_p6, %p2639_p1 }
  0x71   : > { %2649 = shalt.err (!%p2646_p9)
}
  0x72   : > { %s3120_s26 = smov 512   ;;  %s3121_s1 = smov 32  }
  0x73   : > { %2429 = dma.hbm_to_vmem [thread:$0]  (!%p3260_p12), %s3952_s5, 8192, %s384_s29, [#allocation14], %s3120_s26, %s3120_s26, %s3121_s1  }
  0x74   : > { %s3122_s14 = smov [#allocation12]   ;;  %s3123_s17 = smov [#allocation15]  }
  0x75   : > { %s370_s16 = sshll.u32 %s3122_s14, 4  ;;  %s399_s21 = sshll.u32 %s3123_s17, 4  ;;  %s371_s16 = int_to_ptr.vmem [resolvable:$true] %s370_s16  ;;  %s400_s21 = int_to_ptr.vmem [resolvable:$true] %s399_s21 }
  0x76   : > { %s3953_s4 = sld [smem:[#allocation60_spill]] }
  0x7c   : > { %s2650_s22 = scalar_lea.hbm %s3953_s4, 8192 }
  0x7d   : > { %p2651_p6 = scmp.ne.s32.totalorder %s3953_s4, %s2650_s22  ;;  %p2657_p3 = scmp.lt.u32.totalorder %s2650_s22, %s3953_s4 }
  0x7f   : > { %p2653_p9 = pnand %p2651_p6, %p3276_p0 }
  0x81   : > { %p2654_p2 = pneg %p2653_p9 }
  0x83   : > { %p2659_p4 = pnand %p2657_p3, %p2654_p2 }
  0x85   : > { %2662 = shalt.err (!%p2659_p4)
}
  0x86   : > { %s2663_s29 = scalar_lea.vmem %s371_s16, 8192  ;;  %p2671_p13 = scmp.lt.s32.totalorder %s371_s16, %s371_s16 }
  0x87   : > { %p2664_p5 = scmp.ne.s32.totalorder %s371_s16, %s2663_s29  ;;  %p2672_p1 = scmp.lt.s32.totalorder %s2663_s29, %s2663_s29 }
  0x89   : > { %p2666_p7 = pnand %p2664_p5, %p3276_p0  ;;  %p2673_p8 = por %p2672_p1, %p2671_p13 }
  0x8b   : > { %p2667_p11 = pneg %p2666_p7 }
  0x8d   : > { %p2674_p10 = pnand %p2673_p8, %p2667_p11 }
  0x8f   : > { %2677 = shalt.err (!%p2674_p10)
}
  0x90   : > { %2426 = dma.hbm_to_vmem [thread:$0]  (!%p3260_p12), %s3953_s4, 8192, %s371_s16, [#allocation11], %s3120_s26, %s3120_s26, %s3121_s1  }
  0x91   : > { %s3954_s7 = sld [smem:[#allocation63_spill]] }
  0x97   : > { %s2678_s9 = scalar_lea.hbm %s3954_s7, 8192 }
  0x98   : > { %p2679_p6 = scmp.ne.s32.totalorder %s3954_s7, %s2678_s9  ;;  %p2685_p3 = scmp.lt.u32.totalorder %s2678_s9, %s3954_s7 }
  0x9a   : > { %p2681_p9 = pnand %p2679_p6, %p3276_p0 }
  0x9c   : > { %p2682_p2 = pneg %p2681_p9 }
  0x9e   : > { %p2687_p4 = pnand %p2685_p3, %p2682_p2 }
  0xa0   : > { %2690 = shalt.err (!%p2687_p4)
}
  0xa1   : > { %s2691_s30 = scalar_lea.vmem %s400_s21, 8192  ;;  %p2699_p13 = scmp.lt.s32.totalorder %s400_s21, %s400_s21 }
  0xa2   : > { %p2692_p5 = scmp.ne.s32.totalorder %s400_s21, %s2691_s30  ;;  %p2700_p1 = scmp.lt.s32.totalorder %s2691_s30, %s2691_s30 }
  0xa4   : > { %p2694_p7 = pnand %p2692_p5, %p3276_p0  ;;  %p2701_p8 = por %p2700_p1, %p2699_p13 }
  0xa6   : > { %p2695_p11 = pneg %p2694_p7 }
  0xa8   : > { %p2702_p10 = pnand %p2701_p8, %p2695_p11 }
  0xaa   : > { %2705 = shalt.err (!%p2702_p10)
}
  0xab   : > { %2432 = dma.hbm_to_vmem [thread:$0]  (!%p3260_p12), %s3954_s7, 8192, %s400_s21, [#allocation14], %s3120_s26, %s3120_s26, %s3121_s1  }
  0xac   : > { %s3124_s29 = smov [#allocation16]   ;;  %s3955_s8 = sld [smem:[#allocation64_spill]] }
  0xad   : > { %s412_s2 = sshll.u32 %s3124_s29, 4  ;;  %s413_s2 = int_to_ptr.vmem [resolvable:$true] %s412_s2 }
  0xb2   : > { %s2706_s12 = scalar_lea.hbm %s3955_s8, 8192 }
  0xb3   : > { %p2707_p6 = scmp.ne.s32.totalorder %s3955_s8, %s2706_s12  ;;  %p2713_p3 = scmp.lt.u32.totalorder %s2706_s12, %s3955_s8 }
  0xb5   : > { %p2709_p9 = pnand %p2707_p6, %p3276_p0 }
  0xb7   : > { %p2710_p2 = pneg %p2709_p9 }
  0xb9   : > { %p2715_p4 = pnand %p2713_p3, %p2710_p2 }
  0xbb   : > { %2718 = shalt.err (!%p2715_p4)
}
  0xbc   : > { %s2719_s21 = scalar_lea.vmem %s413_s2, 8192  ;;  %p2727_p13 = scmp.lt.s32.totalorder %s413_s2, %s413_s2 }
  0xbd   : > { %p2720_p5 = scmp.ne.s32.totalorder %s413_s2, %s2719_s21  ;;  %p2728_p1 = scmp.lt.s32.totalorder %s2719_s21, %s2719_s21 }
  0xbf   : > { %p2722_p7 = pnand %p2720_p5, %p3276_p0  ;;  %p2729_p8 = por %p2728_p1, %p2727_p13 }
  0xc1   : > { %p2723_p11 = pneg %p2722_p7 }
  0xc3   : > { %p2730_p10 = pnand %p2729_p8, %p2723_p11 }
  0xc5   : > { %2733 = shalt.err (!%p2730_p10)
}
  0xc6   : > { %2435 = dma.hbm_to_vmem [thread:$0]  (!%p3260_p12), %s3955_s8, 8192, %s413_s2, [#allocation17], %s3120_s26, %s3120_s26, %s3121_s1  }
  0xc7   : > { %s1978_s27 = sadd.s32 4294967294, %s3112_s20   ;;  %s3413_s25 = sadd.s32 1, %s3112_s20  }
  0xc8   : > { %s211_s16 = ssub.s32 %s3112_s20, %s3413_s25  ;;  %s214_s22 = sadd.s32 1, %s3108_s19 }
  0xc9   : > { %p212_p0 = scmp.eq.s32.totalorder %s211_s16, 0  ;;  %p221_p6 = scmp.ne.s32.totalorder %s3108_s19, %s3104_s18 }
  0xca   : > { %p222_p9 = scmp.eq.s32.totalorder %s3112_s20, 0  ;;  %p227_p2 = scmp.ne.s32.totalorder %s3104_s18, %s3100_s0 }
  0xcb   : > { %s3424_s29 = scalar_select %p212_p0, %s3108_s19, %s214_s22  }
  0xcc   : > { %p3426_p3 = por %p222_p9, %p221_p6  ;;  %p3957_p12 = scmp.eq.s32.totalorder %s3243_s23, 0 }
  0xcd   : > { %p3932_p5 = scmp.eq.s32.totalorder %s3243_s23, 1  ;;  %p283_p7 = scmp.eq.s32.totalorder %s1978_s27, 1 }
  0xce   : > { %p3432_p4 = por %p3957_p12, %p227_p2  ;;  %p2450_p11 = scmp.lt.s32.totalorder %s3112_s20, 2 }
  0xcf   : > { %s429_s1 = sand.u32 1, %s3112_s20   ;;  %p3441_p13 = por %p3932_p5, %p221_p6 }
  0xd0   : > { %p3445_p1 = por %p283_p7, %p227_p2  ;;  %s431_s12 = sand.u32 1, %s3108_s19  }
  0xd1   : > { %s3959_s2 = scalar_select %p3441_p13, 1, 0 }
  0xd2   : > { %s3960_s15 = scalar_select %p3445_p1, 1, 0 }
  0xd3   : > { %s1987_s9 = sshll.u32 %s431_s12, 7  ;;  %s1988_s13 = sshll.u32 %s3112_s20, 7 }
  0xd4   : > { %s3961_s10 = sld [smem:[#allocation66_spill]]  ;;  %s433_s28 = scalar_lea.vmem [#allocation18], %s1987_s9 }
  0xd5   : > { %s439_s30 = sshll.u32 %s433_s28, 4  ;;  %p3458_p8 = pnand %p2450_p11, %p3426_p3  ;;  %s3462_s30 = int_to_ptr.vmem [resolvable:$true] %s439_s30 }
  0xd6   : > { %s3464_s16 = scalar_lea.sflag [#allocation8], %s429_s1 }
  0xd7   : > { %p2736_p0 = pneg %p3458_p8 }
  0xda   : > { %s3454_s21 = scalar_lea.hbm %s3961_s10, %s1988_s13  ;;  %s2739_s9 = scalar_lea.hbm %s3961_s10, 4096 }
  0xdb   : > { %s2734_s22 = scalar_lea.hbm %s3454_s21, 2048  ;;  %p2740_p2 = scmp.lt.u32.totalorder %s3454_s21, %s3961_s10 }
  0xdc   : > { %p2735_p10 = scmp.ne.s32.totalorder %s3454_s21, %s2734_s22  ;;  %p2741_p3 = scmp.lt.u32.totalorder %s2739_s9, %s2734_s22 }
  0xdd   : > { %p2743_p7 = scmp.lt.u32.totalorder %s2734_s22, %s3454_s21 }
  0xde   : > { %p2737_p6 = pnand %p2736_p0, %p2735_p10  ;;  %p2742_p12 = por %p2741_p3, %p2740_p2 }
  0xe0   : > { %p2738_p9 = pneg %p2737_p6  ;;  %p2744_p11 = por %p2743_p7, %p2742_p12 }
  0xe2   : > { %p2745_p5 = pnand %p2744_p11, %p2738_p9 }
  0xe4   : > { %2748 = shalt.err (!%p2745_p5)
}
  0xe5   : > { %s2749_s1 = scalar_lea.vmem %s3462_s30, 2048  ;;  %s3125_s17 = smov [#allocation18]  }
  0xe6   : > { %p2750_p10 = scmp.ne.s32.totalorder %s3462_s30, %s2749_s1  ;;  %s2754_s28 = sshll.u32 %s3125_s17, 4  ;;  %s2755_s28 = int_to_ptr.vmem [resolvable:$false] %s2754_s28 }
  0xe7   : > { %s2756_s12 = scalar_lea.vmem %s2755_s28, 4096  ;;  %p2757_p13 = scmp.lt.s32.totalorder %s3462_s30, %s2755_s28 }
  0xe8   : > { %p2752_p6 = pnand %p2750_p10, %p2736_p0  ;;  %p2758_p2 = scmp.lt.s32.totalorder %s2756_s12, %s2749_s1 }
  0xea   : > { %p2753_p1 = pneg %p2752_p6  ;;  %p2759_p3 = por %p2758_p2, %p2757_p13 }
  0xec   : > { %p2760_p12 = pnand %p2759_p3, %p2753_p1 }
  0xee   : > { %2763 = shalt.err (!%p2760_p12)
}
  0xef   : > { %s3126_s22 = smov 256   ;;  %s3963_s3 = smov 8  }
  0xf0   : > { %s3964_s9 = smov 128   ;;  %p3965_p5 = scmp.ne.s32.totalorder %s3947_s24, 0 }
  0xf1   : > { %2439 = dma.hbm_to_vmem [thread:$0]  (!%p3458_p8), %s3454_s21, 2048, %s3462_s30, %s3464_s16, %s3126_s22, %s3964_s9, %s3963_s3  }
  0xf2   : > { %457 = sbr.rel (%p3965_p5) target bundleno = 1284 (0x504), region = 60  ;;  %p3966_p0 = scmp.eq.s32.totalorder (!%p3965_p5), %s3243_s23, 0 }
  0xf9   : > { %3055 = dma.done.wait (%p3966_p0), [#allocation8], 256   ;;  %p3967_p9 = pmov %p3966_p0 }
  0xfa   : > { %p3968_p13 = pmov %p3966_p0 }
  0xfb   : > { %3057 = vsyncadd (%p3967_p9), [#allocation8], 4294967040 }
  0xfc   : > { %3059 = dma.done.wait (%p3968_p13), [#allocation11], 8448   ;;  %p3969_p1 = pmov %p3966_p0 }
  0xfd   : > { %p3970_p7 = pmov %p3966_p0 }
  0xfe   : > { %3061 = vsyncadd (%p3969_p1), [#allocation11], 4294958848 }
  0xff   : > { %3063 = dma.done.wait (%p3970_p7), [#allocation14], 16384   ;;  %p3971_p8 = pmov %p3966_p0 }
 0x100   : > { %p3972_p11 = pmov %p3966_p0 }
 0x101   : > { %3065 = vsyncadd (%p3971_p8), [#allocation14], 4294950912 }
 0x102   : > { %3067 = dma.done.wait (%p3972_p11), [#allocation17], 8192   ;;  %p3973_p10 = pmov %p3966_p0 }
 0x103   : > { %s483_s24 = sand.u32 1, %s3243_s23   ;;  %s3514_s21 = sand.u32 1, %s3104_s18  }
 0x104   : > { %3069 = vsyncadd (%p3973_p10), [#allocation17], 4294959104  ;;  %s1996_s30 = sshll.u32 %s3514_s21, 7  ;;  %s484_s27 = scalar_lea.sflag [#allocation8], %s483_s24 }
 0x105   : > { %s3517_s16 = scalar_lea.vmem [#allocation18], %s1996_s30 }
 0x106   : > { %3071 = dma.done.wait (%p3432_p4), %s484_s27, 2048  }
 0x107   : > { %3073 = vsyncadd (%p3432_p4), %s484_s27, 4294965248  ;;  %s1997_s13 = sshll.u32 %s3514_s21, 3  ;;  %p531_p6 = scmp.lt.s32.totalorder %s3243_s23, 1 }
 0x108   : > { %s3532_s12 = scalar_lea.vmem [#allocation19], %s1997_s13  ;;  %p3974_p2 = scmp.ne.s32.totalorder %s3243_s23, 0 }
 0x109   : > { %s3526_s14 = scalar_select %p531_p6, %s3243_s23, 1 }
 0x10a   : > { %537 = sbr.rel (%p3974_p2) target bundleno = 1017 (0x3f9), region = 92  ;;  %v666_v0 = vld [vmem:[#allocation13 + $0x8] sm:$0xff] (!%p3974_p2)  ;;  %v731_v2 = vlaneseq (!%p3974_p2)  ;;  %s3536_s26 = sld [smem:[#allocation6]] (!%p3974_p2)  ;;  %v668_v5 = vld [vmem:[#allocation13 + $0x18] sm:$0xff] (!%p3974_p2)  ;;  %v665_v7 = vld [vmem:[#allocation13] sm:$0xff] (!%p3974_p2)  ;;  %v3129_v24 = vmov (!%p3974_p2), 0.0  }
 0x10b   : > { %v670_v1 = vld [vmem:[#allocation13 + $0x28] sm:$0xff] (!%p3974_p2)  ;;  %s3975_s6 = sld [smem:[#allocation62_spill]] (!%p3974_p2)  ;;  %v672_v6 = vld [vmem:[#allocation13 + $0x38] sm:$0xff] (!%p3974_p2)  ;;  %s3541_s9 = sld [smem:[#allocation6 + $0x1]] (!%p3974_p2)  ;;  %v669_v10 = vld [vmem:[#allocation13 + $0x20] sm:$0xff] (!%p3974_p2)  ;;  %815 = vmatprep.mubr.f32.mxu0 (!%p3974_p2), %v3129_v24  ;;  %886 = vmatprep.mubr.f32.mxu1 (!%p3974_p2), %v3129_v24 }
 0x10c   : > { %v2089_v4 = vpack.c.bf16 (!%p3974_p2), %v670_v1, %v666_v0  ;;  %v3543_v8 = vshrl.u32 (!%p3974_p2), %v731_v2, 7  ;;  %v2121_v9 = vpack.c.bf16 (!%p3974_p2), %v672_v6, %v668_v5  ;;  %v667_v11 = vld [vmem:[#allocation13 + $0x10] sm:$0xff] (!%p3974_p2)  ;;  %s3127_s24 = smov (!%p3974_p2), [#allocation2]   ;;  %v2091_v13 = vpack.c.bf16 (!%p3974_p2), %v669_v10, %v665_v7  ;;  %v674_v15 = vld [vmem:[#allocation13 + $0x48] sm:$0xff] (!%p3974_p2)  ;;  %v676_v17 = vld [vmem:[#allocation13 + $0x58] sm:$0xff] (!%p3974_p2)  ;;  %s3128_s27 = smov (!%p3974_p2), [#allocation2 + $0x1]  }
 0x10d   : > { %v671_v12 = vld [vmem:[#allocation13 + $0x30] sm:$0xff] (!%p3974_p2)  ;;  %s548_s30 = sshll.u32 (!%p3974_p2), %s3127_s24, 4  ;;  %v678_v16 = vld [vmem:[#allocation13 + $0x68] sm:$0xff] (!%p3974_p2)  ;;  %s564_s13 = sshll.u32 (!%p3974_p2), %s3128_s27, 4  ;;  %v680_v22 = vld [vmem:[#allocation13 + $0x78] sm:$0xff] (!%p3974_p2)  ;;  %s3549_s30 = int_to_ptr.vmem [resolvable:$true] %s548_s30  ;;  %s3551_s13 = int_to_ptr.vmem [resolvable:$true] %s564_s13 }
 0x10e   : > { %2090 = vmatprep.subr.bf16.mxu0 (!%p3974_p2), %v2089_v4  ;;  %v2123_v14 = vpack.c.bf16 (!%p3974_p2), %v671_v12, %v667_v11  ;;  %v733_v18 = vsub.s32 (!%p3974_p2), 0, %v3543_v8  ;;  %v737_v19 = vsub.s32 (!%p3974_p2), 1, %v3543_v8  ;;  %v741_v20 = vsub.s32 (!%p3974_p2), 2, %v3543_v8  ;;  %2122 = vmatprep.subr.bf16.mxu1 (!%p3974_p2), %v2121_v9  ;;  %v673_v23 = vld [vmem:[#allocation13 + $0x40] sm:$0xff] (!%p3974_p2)  ;;  %v675_v28 = vld [vmem:[#allocation13 + $0x50] sm:$0xff] (!%p3974_p2)  ;;  %s3554_s1 = sld [smem:[#allocation6 + $0x2]] (!%p3974_p2) }
 0x10f   : > { %v745_v21 = vsub.s32 (!%p3974_p2), 3, %v3543_v8  ;;  %2092 = vmatpush1.bf16.msra.mxu0 (!%p3974_p2), %v2091_v13  ;;  %v2093_v25 = vpack.c.bf16 (!%p3974_p2), %v678_v16, %v674_v15  ;;  %v2125_v26 = vpack.c.bf16 (!%p3974_p2), %v680_v22, %v676_v17  ;;  %v677_v27 = vld [vmem:[#allocation13 + $0x60] sm:$0xff] (!%p3974_p2)  ;;  %v679_v29 = vld [vmem:[#allocation13 + $0x70] sm:$0xff] (!%p3974_p2)  ;;  %v682_v34 = vld [vmem:[#allocation13 + $0x88] sm:$0xff] (!%p3974_p2)  ;;  %s3130_s22 = smov (!%p3974_p2), [#allocation2 + $0x2]   ;;  %s3976_s28 = sld [smem:[#allocation57_spill]] (!%p3974_p2) }
 0x110   : > { %2124 = vmatpush1.bf16.msra.mxu1 (!%p3974_p2), %v2123_v14  ;;  %v686_v35 = vld [vmem:[#allocation13 + $0xa8] sm:$0xff] (!%p3974_p2)  ;;  %v684_v36 = vld [vmem:[#allocation13 + $0x98] sm:$0xff] (!%p3974_p2)  ;;  %s1999_s17 = sshll.u32 (!%p3974_p2), %s3536_s26, 4  ;;  %s3573_s3 = sshll.u32 (!%p3974_p2), %s3130_s22, 4  ;;  %v2095_v37 = vpack.c.bf16 (!%p3974_p2), %v677_v27, %v673_v23  ;;  %v2127_v38 = vpack.c.bf16 (!%p3974_p2), %v679_v29, %v675_v28  ;;  %v3576_v41 = vld [vmem:[#allocation13 + $0x80] sm:$0xff] (!%p3974_p2)  ;;  %s3618_s3 = int_to_ptr.vmem [resolvable:$true] %s3573_s3 }
 0x111   : > { %v729_v3 = vld [vmem:[%s3975_s6] sm:$0xf]  ;;  %2094 = vmatprep.subr.bf16.mxu0 %v2093_v25  ;;  %2126 = vmatprep.subr.bf16.mxu1 %v2125_v26  ;;  %v2097_v39 = vpack.c.bf16 %v686_v35, %v682_v34  ;;  %v688_v40 = vld [vmem:[#allocation13 + $0xb8] sm:$0xff]  ;;  %v3578_v42 = vld [vmem:[#allocation13 + $0xa0] sm:$0xff]  ;;  %s2001_s26 = sshll.u32 %s3541_s9, 4 }
 0x112   : > { %v3558_v30 = vrot.slane %v729_v3, %v733_v18  ;;  %v3562_v31 = vrot.slane %v729_v3, %v737_v19  ;;  %v3566_v32 = vrot.slane %v729_v3, %v741_v20  ;;  %v3570_v33 = vrot.slane %v729_v3, %v745_v21  ;;  %v3584_v44 = vld [vmem:[#allocation13 + $0x90] sm:$0xff]  ;;  %v3588_v46 = vld [vmem:[#allocation13 + $0xc8] sm:$0xff] }
 0x113   : > { %v2129_v43 = vpack.c.bf16 %v688_v40, %v684_v36  ;;  %v3586_v45 = vld [vmem:[#allocation13 + $0xb0] sm:$0xff] }
 0x115   : > { %s540_s4 = scalar_lea.hbm %s3976_s28, %s1999_s17  ;;  %s3593_s7 = scalar_lea.hbm %s3976_s28, 4096 }
 0x116   : > { %s2764_s22 = scalar_lea.hbm %s540_s4, 16  ;;  %p2767_p3 = scmp.lt.u32.totalorder %s540_s4, %s3976_s28 }
 0x117   : > { %p2765_p4 = scmp.ne.s32.totalorder %s540_s4, %s2764_s22  ;;  %p2768_p12 = scmp.lt.u32.totalorder %s3593_s7, %s2764_s22 }
 0x118   : > { %p2770_p0 = scmp.lt.u32.totalorder %s2764_s22, %s540_s4 }
 0x119   : > { %p2769_p5 = por %p2768_p12, %p2767_p3 }
 0x11b   : > { %p2771_p9 = por %p2770_p0, %p2769_p5 }
 0x11d   : > { %p2772_p13 = pnand %p2771_p9, %p2765_p4 }
 0x11f   : > { %2775 = shalt.err (!%p2772_p13)  }
 0x120   : > { %s2776_s17 = scalar_lea.vmem %s3549_s30, 16  ;;  %s3602_s5 = scalar_lea.vmem %s3549_s30, 128 }
 0x121   : > { %p2777_p1 = scmp.ne.s32.totalorder %s3549_s30, %s2776_s17  ;;  %p2781_p7 = scmp.lt.s32.totalorder %s3549_s30, %s3549_s30 }
 0x122   : > { %p2782_p8 = scmp.lt.s32.totalorder %s3602_s5, %s2776_s17 }
 0x124   : > { %p2783_p11 = por %p2782_p8, %p2781_p7 }
 0x126   : > { %p2784_p10 = pnand %p2783_p11, %p2777_p1 }
 0x128   : > { %2787 = shalt.err (!%p2784_p10)  }
 0x129   : > { %551 = dma.hbm_to_vmem [thread:$0]  %s540_s4, 16, %s3549_s30, [#allocation3]  ;;  %2096 = vmatpush1.bf16.msra.mxu0 %v2095_v37  ;;  %2128 = vmatpush1.bf16.msra.mxu1 %v2127_v38  ;;  %v2099_v47 = vpack.c.bf16 %v3578_v42, %v3576_v41  ;;  %v2131_v48 = vpack.c.bf16 %v3586_v45, %v3584_v44  ;;  %v694_v49 = vld [vmem:[#allocation13 + $0xe8] sm:$0xff]  ;;  %v692_v50 = vld [vmem:[#allocation13 + $0xd8] sm:$0xff]  ;;  %v3621_v54 = vld [vmem:[#allocation13 + $0xc0] sm:$0xff] }
 0x12a   : > { %v696_v51 = vld [vmem:[#allocation13 + $0xf8] sm:$0xff]  ;;  %s554_s10 = scalar_lea.hbm %s3976_s28, %s2001_s26  ;;  %2098 = vmatprep.subr.bf16.mxu0 %v2097_v39  ;;  %2130 = vmatprep.subr.bf16.mxu1 %v2129_v43  ;;  %v2101_v52 = vpack.c.bf16 %v694_v49, %v3588_v46  ;;  %v3623_v55 = vld [vmem:[#allocation13 + $0xe0] sm:$0xff]  ;;  %v3625_v56 = vld [vmem:[#allocation13 + $0xd0] sm:$0xff] }
 0x12b   : > { %v2133_v53 = vpack.c.bf16 %v696_v51, %v692_v50  ;;  %s2788_s4 = scalar_lea.hbm %s554_s10, 16  ;;  %p2791_p2 = scmp.lt.u32.totalorder %s554_s10, %s3976_s28 }
 0x12c   : > { %p2789_p6 = scmp.ne.s32.totalorder %s554_s10, %s2788_s4  ;;  %p2792_p4 = scmp.lt.u32.totalorder %s3593_s7, %s2788_s4 }
 0x12d   : > { %p2794_p12 = scmp.lt.u32.totalorder %s2788_s4, %s554_s10 }
 0x12e   : > { %p2793_p3 = por %p2792_p4, %p2791_p2 }
 0x130   : > { %p2795_p5 = por %p2794_p12, %p2793_p3 }
 0x132   : > { %p2796_p0 = pnand %p2795_p5, %p2789_p6 }
 0x134   : > { %2799 = shalt.err (!%p2796_p0)  }
 0x135   : > { %s2800_s27 = scalar_lea.vmem %s3551_s13, 16  ;;  %p2805_p13 = scmp.lt.s32.totalorder %s3551_s13, %s3549_s30 }
 0x136   : > { %p2801_p9 = scmp.ne.s32.totalorder %s3551_s13, %s2800_s27  ;;  %p2806_p1 = scmp.lt.s32.totalorder %s3602_s5, %s2800_s27 }
 0x138   : > { %p2807_p7 = por %p2806_p1, %p2805_p13 }
 0x13a   : > { %p2808_p8 = pnand %p2807_p7, %p2801_p9 }
 0x13c   : > { %2811 = shalt.err (!%p2808_p8)  }
 0x13d   : > { %567 = dma.hbm_to_vmem [thread:$0]  %s554_s10, 16, %s3551_s13, [#allocation3 + $0x1]  ;;  %v695_v57 = vld [vmem:[#allocation13 + $0xf0] sm:$0xff]  ;;  %v698_v58 = vld [vmem:[#allocation13 + $0x108] sm:$0xff]  ;;  %v700_v60 = vld [vmem:[#allocation13 + $0x118] sm:$0xff]  ;;  %2100 = vmatpush1.bf16.msra.mxu0 %v2099_v47  ;;  %2132 = vmatpush1.bf16.msra.mxu1 %v2131_v48  ;;  %v2103_v62 = vpack.c.bf16 %v3623_v55, %v3621_v54 }
 0x13e   : > { %v702_v59 = vld [vmem:[#allocation13 + $0x128] sm:$0xff]  ;;  %s2003_s26 = sshll.u32 %s3554_s1, 4  ;;  %s3638_s22 = sld [smem:[#allocation6 + $0x3]]  ;;  %v704_v61 = vld [vmem:[#allocation13 + $0x138] sm:$0xff]  ;;  %v2135_v63 = vpack.c.bf16 %v695_v57, %v3625_v56  ;;  %v3646_v0 = vld [vmem:[#allocation13 + $0x100] sm:$0xff] }
 0x13f   : > { %s570_s8 = scalar_lea.hbm %s3976_s28, %s2003_s26  ;;  %v3648_v1 = vld [vmem:[#allocation13 + $0x120] sm:$0xff] }
 0x140   : > { %s2812_s13 = scalar_lea.hbm %s570_s8, 16  ;;  %p2815_p10 = scmp.lt.u32.totalorder %s570_s8, %s3976_s28 }
 0x141   : > { %p2813_p11 = scmp.ne.s32.totalorder %s570_s8, %s2812_s13  ;;  %p2816_p6 = scmp.lt.u32.totalorder %s3593_s7, %s2812_s13 }
 0x142   : > { %p2818_p4 = scmp.lt.u32.totalorder %s2812_s13, %s570_s8 }
 0x143   : > { %p2817_p2 = por %p2816_p6, %p2815_p10 }
 0x145   : > { %p2819_p3 = por %p2818_p4, %p2817_p2 }
 0x147   : > { %p2820_p12 = pnand %p2819_p3, %p2813_p11 }
 0x149   : > { %2823 = shalt.err (!%p2820_p12)  }
 0x14a   : > { %s2824_s4 = scalar_lea.vmem %s3618_s3, 16  ;;  %p2829_p0 = scmp.lt.s32.totalorder %s3618_s3, %s3549_s30 }
 0x14b   : > { %p2825_p5 = scmp.ne.s32.totalorder %s3618_s3, %s2824_s4  ;;  %p2830_p9 = scmp.lt.s32.totalorder %s3602_s5, %s2824_s4 }
 0x14d   : > { %p2831_p13 = por %p2830_p9, %p2829_p0 }
 0x14f   : > { %p2832_p1 = pnand %p2831_p13, %p2825_p5 }
 0x151   : > { %2835 = shalt.err (!%p2832_p1)  }
 0x152   : > { %583 = dma.hbm_to_vmem [thread:$0]  %s570_s8, 16, %s3618_s3, [#allocation3 + $0x2]  ;;  %2102 = vmatprep.subr.bf16.mxu0 %v2101_v52  ;;  %2134 = vmatprep.subr.bf16.mxu1 %v2133_v53  ;;  %v2105_v2 = vpack.c.bf16 %v702_v59, %v698_v58  ;;  %v2137_v3 = vpack.c.bf16 %v704_v61, %v700_v60  ;;  %v699_v4 = vld [vmem:[#allocation13 + $0x110] sm:$0xff]  ;;  %v706_v6 = vld [vmem:[#allocation13 + $0x148] sm:$0xff]  ;;  %v708_v9 = vld [vmem:[#allocation13 + $0x158] sm:$0xff]  ;;  %v2107_v11 = vpack.c.bf16 %v3648_v1, %v3646_v0 }
 0x153   : > { %v703_v5 = vld [vmem:[#allocation13 + $0x130] sm:$0xff]  ;;  %s3131_s9 = smov [#allocation2 + $0x3]   ;;  %s3660_s27 = sld [smem:[#allocation6 + $0x4]]  ;;  %v710_v7 = vld [vmem:[#allocation13 + $0x168] sm:$0xff]  ;;  %v712_v10 = vld [vmem:[#allocation13 + $0x178] sm:$0xff]  ;;  %2104 = vmatpush1.bf16.msra.mxu0 %v2103_v62  ;;  %2136 = vmatpush1.bf16.msra.mxu1 %v2135_v63 }
 0x154   : > { %s596_s24 = sshll.u32 %s3131_s9, 4  ;;  %s3132_s26 = smov [#allocation2 + $0x4]   ;;  %v2139_v12 = vpack.c.bf16 %v703_v5, %v699_v4  ;;  %v3668_v13 = vld [vmem:[#allocation13 + $0x140] sm:$0xff]  ;;  %2106 = vmatprep.subr.bf16.mxu0 %v2105_v2  ;;  %2138 = vmatprep.subr.bf16.mxu1 %v2137_v3  ;;  %v2109_v15 = vpack.c.bf16 %v710_v7, %v706_v6  ;;  %v2141_v16 = vpack.c.bf16 %v712_v10, %v708_v9  ;;  %v3675_v17 = vld [vmem:[#allocation13 + $0x150] sm:$0xff]  ;;  %v3679_v23 = vld [vmem:[#allocation13 + $0x188] sm:$0xff]  ;;  %s3662_s24 = int_to_ptr.vmem [resolvable:$true] %s596_s24 }
 0x155   : > { %s612_s17 = sshll.u32 %s3132_s26, 4  ;;  %s3664_s3 = sld [smem:[#allocation6 + $0x5]]  ;;  %v3670_v14 = vld [vmem:[#allocation13 + $0x160] sm:$0xff]  ;;  %v3677_v22 = vld [vmem:[#allocation13 + $0x170] sm:$0xff]  ;;  %v3684_v25 = vld [vmem:[#allocation13 + $0x1a8] sm:$0xff]  ;;  %s3673_s17 = int_to_ptr.vmem [resolvable:$true] %s612_s17 }
 0x156   : > { %s2005_s6 = sshll.u32 %s3638_s22, 4  ;;  %v3686_v26 = vld [vmem:[#allocation13 + $0x198] sm:$0xff] }
 0x157   : > { %s586_s1 = scalar_lea.hbm %s3976_s28, %s2005_s6  ;;  %v3688_v27 = vld [vmem:[#allocation13 + $0x1b8] sm:$0xff] }
 0x158   : > { %s2836_s22 = scalar_lea.hbm %s586_s1, 16  ;;  %p2839_p8 = scmp.lt.u32.totalorder %s586_s1, %s3976_s28 }
 0x159   : > { %p2837_p7 = scmp.ne.s32.totalorder %s586_s1, %s2836_s22  ;;  %p2840_p11 = scmp.lt.u32.totalorder %s3593_s7, %s2836_s22 }
 0x15a   : > { %p2842_p6 = scmp.lt.u32.totalorder %s2836_s22, %s586_s1 }
 0x15b   : > { %p2841_p10 = por %p2840_p11, %p2839_p8 }
 0x15d   : > { %p2843_p2 = por %p2842_p6, %p2841_p10 }
 0x15f   : > { %p2844_p4 = pnand %p2843_p2, %p2837_p7 }
 0x161   : > { %2847 = shalt.err (!%p2844_p4)  }
 0x162   : > { %s2848_s9 = scalar_lea.vmem %s3662_s24, 16  ;;  %p2853_p12 = scmp.lt.s32.totalorder %s3662_s24, %s3549_s30 }
 0x163   : > { %p2849_p3 = scmp.ne.s32.totalorder %s3662_s24, %s2848_s9  ;;  %p2854_p5 = scmp.lt.s32.totalorder %s3602_s5, %s2848_s9 }
 0x165   : > { %p2855_p0 = por %p2854_p5, %p2853_p12 }
 0x167   : > { %p2856_p9 = pnand %p2855_p0, %p2849_p3 }
 0x169   : > { %2859 = shalt.err (!%p2856_p9)  }
 0x16a   : > { %599 = dma.hbm_to_vmem [thread:$0]  %s586_s1, 16, %s3662_s24, [#allocation3 + $0x3]  ;;  %2108 = vmatpush1.bf16.msra.mxu0 %v2107_v11  ;;  %2140 = vmatpush1.bf16.msra.mxu1 %v2139_v12  ;;  %v2111_v28 = vpack.c.bf16 %v3670_v14, %v3668_v13  ;;  %v2143_v29 = vpack.c.bf16 %v3677_v22, %v3675_v17  ;;  %v3705_v34 = vld [vmem:[#allocation13 + $0x180] sm:$0xff]  ;;  %v2113_v36 = vpack.c.bf16 %v3684_v25, %v3679_v23  ;;  %v715_v38 = vld [vmem:[#allocation13 + $0x190] sm:$0xff]  ;;  %v3718_v40 = vld [vmem:[#allocation13 + $0x1c8] sm:$0xff] }
 0x16b   : > { %s2007_s26 = sshll.u32 %s3660_s27, 4  ;;  %s3133_s6 = smov [#allocation2 + $0x5]   ;;  %v3707_v35 = vld [vmem:[#allocation13 + $0x1a0] sm:$0xff]  ;;  %2110 = vmatprep.subr.bf16.mxu0 %v2109_v15  ;;  %2142 = vmatprep.subr.bf16.mxu1 %v2141_v16  ;;  %v2145_v37 = vpack.c.bf16 %v3688_v27, %v3686_v26  ;;  %v719_v39 = vld [vmem:[#allocation13 + $0x1b0] sm:$0xff] }
 0x16c   : > { %s628_s8 = sshll.u32 %s3133_s6, 4  ;;  %s602_s24 = scalar_lea.hbm %s3976_s28, %s2007_s26  ;;  %s3712_s8 = int_to_ptr.vmem [resolvable:$true] %s628_s8 }
 0x16d   : > { %s2860_s27 = scalar_lea.hbm %s602_s24, 16  ;;  %p2863_p1 = scmp.lt.u32.totalorder %s602_s24, %s3976_s28 }
 0x16e   : > { %p2861_p13 = scmp.ne.s32.totalorder %s602_s24, %s2860_s27  ;;  %p2864_p7 = scmp.lt.u32.totalorder %s3593_s7, %s2860_s27 }
 0x16f   : > { %p2866_p11 = scmp.lt.u32.totalorder %s2860_s27, %s602_s24 }
 0x170   : > { %p2865_p8 = por %p2864_p7, %p2863_p1 }
 0x172   : > { %p2867_p10 = por %p2866_p11, %p2865_p8 }
 0x174   : > { %p2868_p6 = pnand %p2867_p10, %p2861_p13 }
 0x176   : > { %2871 = shalt.err (!%p2868_p6)  }
 0x177   : > { %s2872_s4 = scalar_lea.vmem %s3673_s17, 16  ;;  %p2877_p4 = scmp.lt.s32.totalorder %s3673_s17, %s3549_s30 }
 0x178   : > { %p2873_p2 = scmp.ne.s32.totalorder %s3673_s17, %s2872_s4  ;;  %p2878_p3 = scmp.lt.s32.totalorder %s3602_s5, %s2872_s4 }
 0x17a   : > { %p2879_p12 = por %p2878_p3, %p2877_p4 }
 0x17c   : > { %p2880_p5 = pnand %p2879_p12, %p2873_p2 }
 0x17e   : > { %2883 = shalt.err (!%p2880_p5)  }
 0x17f   : > { %615 = dma.hbm_to_vmem [thread:$0]  %s602_s24, 16, %s3673_s17, [#allocation3 + $0x4]  ;;  %v726_v41 = vld [vmem:[#allocation13 + $0x1e8] sm:$0xff]  ;;  %v724_v42 = vld [vmem:[#allocation13 + $0x1d8] sm:$0xff]  ;;  %2112 = vmatpush1.bf16.msra.mxu0 %v2111_v28  ;;  %2144 = vmatpush1.bf16.msra.mxu1 %v2143_v29  ;;  %v2115_v44 = vpack.c.bf16 %v3707_v35, %v3705_v34  ;;  %v2147_v45 = vpack.c.bf16 %v719_v39, %v715_v38  ;;  %v721_v46 = vld [vmem:[#allocation13 + $0x1c0] sm:$0xff] }
 0x180   : > { %v728_v43 = vld [vmem:[#allocation13 + $0x1f8] sm:$0xff]  ;;  %s2009_s9 = sshll.u32 %s3664_s3, 4  ;;  %s3731_s26 = sld [smem:[#allocation6 + $0x6]] }
 0x181   : > { %s618_s22 = scalar_lea.hbm %s3976_s28, %s2009_s9 }
 0x182   : > { %s2884_s27 = scalar_lea.hbm %s618_s22, 16  ;;  %p2887_p9 = scmp.lt.u32.totalorder %s618_s22, %s3976_s28 }
 0x183   : > { %p2885_p0 = scmp.ne.s32.totalorder %s618_s22, %s2884_s27  ;;  %p2888_p13 = scmp.lt.u32.totalorder %s3593_s7, %s2884_s27 }
 0x184   : > { %p2890_p7 = scmp.lt.u32.totalorder %s2884_s27, %s618_s22 }
 0x185   : > { %p2889_p1 = por %p2888_p13, %p2887_p9 }
 0x187   : > { %p2891_p8 = por %p2890_p7, %p2889_p1 }
 0x189   : > { %p2892_p11 = pnand %p2891_p8, %p2885_p0 }
 0x18b   : > { %2895 = shalt.err (!%p2892_p11)  }
 0x18c   : > { %s2896_s3 = scalar_lea.vmem %s3712_s8, 16  ;;  %p2901_p6 = scmp.lt.s32.totalorder %s3712_s8, %s3549_s30 }
 0x18d   : > { %p2897_p10 = scmp.ne.s32.totalorder %s3712_s8, %s2896_s3  ;;  %p2902_p2 = scmp.lt.s32.totalorder %s3602_s5, %s2896_s3 }
 0x18f   : > { %p2903_p4 = por %p2902_p2, %p2901_p6 }
 0x191   : > { %p2904_p3 = pnand %p2903_p4, %p2897_p10 }
 0x193   : > { %2907 = shalt.err (!%p2904_p3)  }
 0x194   : > { %631 = dma.hbm_to_vmem [thread:$0]  %s618_s22, 16, %s3712_s8, [#allocation3 + $0x5]  ;;  %2114 = vmatprep.subr.bf16.mxu0 %v2113_v36  ;;  %2146 = vmatprep.subr.bf16.mxu1 %v2145_v37  ;;  %v2117_v47 = vpack.c.bf16 %v726_v41, %v3718_v40  ;;  %v2149_v48 = vpack.c.bf16 %v728_v43, %v724_v42  ;;  %v725_v49 = vld [vmem:[#allocation13 + $0x1e0] sm:$0xff]  ;;  %v723_v50 = vld [vmem:[#allocation13 + $0x1d0] sm:$0xff] }
 0x195   : > { %v727_v51 = vld [vmem:[#allocation13 + $0x1f0] sm:$0xff]  ;;  %s3134_s1 = smov [#allocation2 + $0x6]   ;;  %s3749_s4 = sld [smem:[#allocation6 + $0x7]]  ;;  %2116 = vmatpush1.bf16.msra.mxu0 %v2115_v44  ;;  %2148 = vmatpush1.bf16.msra.mxu1 %v2147_v45  ;;  %v2119_v52 = vpack.c.bf16 %v725_v49, %v721_v46 }
 0x196   : > { %s644_s10 = sshll.u32 %s3134_s1, 4  ;;  %s3135_s9 = smov [#allocation2 + $0x7]   ;;  %v2151_v53 = vpack.c.bf16 %v727_v51, %v723_v50  ;;  %2118 = vmatprep.subr.bf16.mxu0 %v2117_v47  ;;  %2150 = vmatprep.subr.bf16.mxu1 %v2149_v48  ;;  %s645_s10 = int_to_ptr.vmem [resolvable:$true] %s644_s10 }
 0x197   : > { %s660_s6 = sshll.u32 %s3135_s9, 4  ;;  %s2011_s8 = sshll.u32 %s3731_s26, 4  ;;  %s3755_s6 = int_to_ptr.vmem [resolvable:$true] %s660_s6 }
 0x198   : > { %s634_s27 = scalar_lea.hbm %s3976_s28, %s2011_s8 }
 0x199   : > { %s2908_s17 = scalar_lea.hbm %s634_s27, 16  ;;  %p2911_p5 = scmp.lt.u32.totalorder %s634_s27, %s3976_s28 }
 0x19a   : > { %p2909_p12 = scmp.ne.s32.totalorder %s634_s27, %s2908_s17  ;;  %p2912_p0 = scmp.lt.u32.totalorder %s3593_s7, %s2908_s17 }
 0x19b   : > { %p2914_p13 = scmp.lt.u32.totalorder %s2908_s17, %s634_s27 }
 0x19c   : > { %p2913_p9 = por %p2912_p0, %p2911_p5 }
 0x19e   : > { %p2915_p1 = por %p2914_p13, %p2913_p9 }
 0x1a0   : > { %p2916_p7 = pnand %p2915_p1, %p2909_p12 }
 0x1a2   : > { %2919 = shalt.err (!%p2916_p7)  }
 0x1a3   : > { %s2920_s26 = scalar_lea.vmem %s645_s10, 16  ;;  %p2925_p11 = scmp.lt.s32.totalorder %s645_s10, %s3549_s30 }
 0x1a4   : > { %p2921_p8 = scmp.ne.s32.totalorder %s645_s10, %s2920_s26  ;;  %p2926_p10 = scmp.lt.s32.totalorder %s3602_s5, %s2920_s26 }
 0x1a6   : > { %p2927_p6 = por %p2926_p10, %p2925_p11 }
 0x1a8   : > { %p2928_p2 = pnand %p2927_p6, %p2921_p8 }
 0x1aa   : > { %2931 = shalt.err (!%p2928_p2)  }
 0x1ab   : > { %647 = dma.hbm_to_vmem [thread:$0]  %s634_s27, 16, %s645_s10, [#allocation3 + $0x6]  ;;  %2120 = vmatpush1.bf16.msra.mxu0 %v2119_v52  ;;  %2152 = vmatpush1.bf16.msra.mxu1 %v2151_v53  ;;  %v664_v54 = vld [vmem:[#allocation7] sm:$0xff] }
 0x1ac   : > { %s2013_s1 = sshll.u32 %s3749_s4, 4 }
 0x1ad   : > { %s650_s13 = scalar_lea.hbm %s3976_s28, %s2013_s1 }
 0x1ae   : > { %s2932_s22 = scalar_lea.hbm %s650_s13, 16  ;;  %p2935_p3 = scmp.lt.u32.totalorder %s650_s13, %s3976_s28 }
 0x1af   : > { %p2933_p4 = scmp.ne.s32.totalorder %s650_s13, %s2932_s22  ;;  %p2936_p12 = scmp.lt.u32.totalorder %s3593_s7, %s2932_s22 }
 0x1b0   : > { %p2938_p0 = scmp.lt.u32.totalorder %s2932_s22, %s650_s13 }
 0x1b1   : > { %p2937_p5 = por %p2936_p12, %p2935_p3 }
 0x1b3   : > { %p2939_p9 = por %p2938_p0, %p2937_p5 }
 0x1b5   : > { %p2940_p13 = pnand %p2939_p9, %p2933_p4 }
 0x1b7   : > { %2943 = shalt.err (!%p2940_p13)  }
 0x1b8   : > { %s2944_s10 = scalar_lea.vmem %s3755_s6, 16  ;;  %p2949_p7 = scmp.lt.s32.totalorder %s3755_s6, %s3549_s30 }
 0x1b9   : > { %p2945_p1 = scmp.ne.s32.totalorder %s3755_s6, %s2944_s10  ;;  %p2950_p8 = scmp.lt.s32.totalorder %s3602_s5, %s2944_s10 }
 0x1bb   : > { %p2951_p11 = por %p2950_p8, %p2949_p7 }
 0x1bd   : > { %p2952_p10 = pnand %p2951_p11, %p2945_p1 }
 0x1bf   : > { %2955 = shalt.err (!%p2952_p10)  }
 0x1c0   : > { %663 = dma.hbm_to_vmem [thread:$0]  %s650_s13, 16, %s3755_s6, [#allocation3 + $0x7]  ;;  %816 = vmatmul.mubr.f32.vlgmr.msra.gmra.mrb[0].mxu0 %v664_v54  ;;  %887 = vmatmul.mubr.f32.vlgmr.msra.gmra.mrb[0].mxu1 %v664_v54 }
 0x1c1   : > { %3074 = dma.done.wait [#allocation3], 16 }
 0x1c2   : > { %3075 = vsyncadd [#allocation3], 4294967280 }
 0x1c3   : > { %3076 = dma.done.wait [#allocation3 + $0x1], 16 }
 0x1c4   : > { %3077 = vsyncadd [#allocation3 + $0x1], 4294967280 }
 0x1c5   : > { %3078 = dma.done.wait [#allocation3 + $0x2], 16 }
 0x1c6   : > { %3079 = vsyncadd [#allocation3 + $0x2], 4294967280 }
 0x1c7   : > { %3080 = dma.done.wait [#allocation3 + $0x3], 16 }
 0x1c8   : > { %3081 = vsyncadd [#allocation3 + $0x3], 4294967280 }
 0x1c9   : > { %3082 = dma.done.wait [#allocation3 + $0x4], 16 }
 0x1ca   : > { %3083 = vsyncadd [#allocation3 + $0x4], 4294967280 }
 0x1cb   : > { %3084 = dma.done.wait [#allocation3 + $0x5], 16 }
 0x1cc   : > { %3085 = vsyncadd [#allocation3 + $0x5], 4294967280 }
 0x1cd   : > { %3086 = dma.done.wait [#allocation3 + $0x6], 16 }
 0x1ce   : > { %3087 = vsyncadd [#allocation3 + $0x6], 4294967280 }
 0x1cf   : > { %3088 = dma.done.wait [#allocation3 + $0x7], 16 }
 0x1d0   : > { %3089 = vsyncadd [#allocation3 + $0x7], 4294967280  ;;  %1039 = vmatprep.mubr.f32.mxu0 %v3129_v24  ;;  %1110 = vmatprep.mubr.f32.mxu1 %v3129_v24  ;;  %v912_v55 = vld [vmem:[#allocation12 + $0x8] sm:$0xff]  ;;  %v911_v57 = vld [vmem:[#allocation12] sm:$0xff]  ;;  %s3977_s5 = sld [smem:[#allocation65_spill]] }
 0x1d1   : > { %v916_v56 = vld [vmem:[#allocation12 + $0x28] sm:$0xff]  ;;  %v915_v59 = vld [vmem:[#allocation12 + $0x20] sm:$0xff]  ;;  %v914_v10 = vld [vmem:[#allocation12 + $0x18] sm:$0xff] }
 0x1d2   : > { %v2153_v58 = vpack.c.bf16 %v916_v56, %v912_v55  ;;  %v920_v60 = vld [vmem:[#allocation12 + $0x48] sm:$0xff]  ;;  %v2155_v62 = vpack.c.bf16 %v915_v59, %v911_v57  ;;  %v919_v0 = vld [vmem:[#allocation12 + $0x40] sm:$0xff]  ;;  %v918_v11 = vld [vmem:[#allocation12 + $0x38] sm:$0xff] }
 0x1d3   : > { %v924_v61 = vld [vmem:[#allocation12 + $0x68] sm:$0xff]  ;;  %v923_v1 = vld [vmem:[#allocation12 + $0x60] sm:$0xff]  ;;  %v2185_v13 = vpack.c.bf16 %v918_v11, %v914_v10  ;;  %v913_v14 = vld [vmem:[#allocation12 + $0x10] sm:$0xff] }
 0x1d4   : > { %v2157_v63 = vpack.c.bf16 %v924_v61, %v920_v60  ;;  %v928_v2 = vld [vmem:[#allocation12 + $0x88] sm:$0xff]  ;;  %2154 = vmatprep.subr.bf16.mxu0 %v2153_v58  ;;  %v2159_v4 = vpack.c.bf16 %v923_v1, %v919_v0  ;;  %v927_v5 = vld [vmem:[#allocation12 + $0x80] sm:$0xff]  ;;  %v917_v15 = vld [vmem:[#allocation12 + $0x30] sm:$0xff] }
 0x1d5   : > { %v932_v3 = vld [vmem:[#allocation12 + $0xa8] sm:$0xff]  ;;  %2156 = vmatpush1.bf16.msra.mxu0 %v2155_v62  ;;  %v931_v6 = vld [vmem:[#allocation12 + $0xa0] sm:$0xff]  ;;  %v2187_v16 = vpack.c.bf16 %v917_v15, %v913_v14  ;;  %2186 = vmatprep.subr.bf16.mxu1 %v2185_v13  ;;  %v922_v22 = vld [vmem:[#allocation12 + $0x58] sm:$0xff] }
 0x1d6   : > { %2158 = vmatprep.subr.bf16.mxu0 %v2157_v63  ;;  %v2161_v7 = vpack.c.bf16 %v932_v3, %v928_v2  ;;  %v936_v9 = vld [vmem:[#allocation12 + $0xc8] sm:$0xff]  ;;  %v2163_v17 = vpack.c.bf16 %v931_v6, %v927_v5  ;;  %v926_v23 = vld [vmem:[#allocation12 + $0x78] sm:$0xff]  ;;  %v921_v25 = vld [vmem:[#allocation12 + $0x50] sm:$0xff] }
 0x1d7   : > { %v940_v12 = vld [vmem:[#allocation12 + $0xe8] sm:$0xff]  ;;  %v935_v27 = vld [vmem:[#allocation12 + $0xc0] sm:$0xff]  ;;  %2188 = vmatpush1.bf16.msra.mxu1 %v2187_v16  ;;  %v2189_v29 = vpack.c.bf16 %v926_v23, %v922_v22  ;;  %v925_v34 = vld [vmem:[#allocation12 + $0x70] sm:$0xff] }
 0x1d8   : > { %v2165_v26 = vpack.c.bf16 %v940_v12, %v936_v9  ;;  %v939_v28 = vld [vmem:[#allocation12 + $0xe0] sm:$0xff]  ;;  %v944_v35 = vld [vmem:[#allocation12 + $0x108] sm:$0xff]  ;;  %v2191_v37 = vpack.c.bf16 %v925_v34, %v921_v25  ;;  %v930_v38 = vld [vmem:[#allocation12 + $0x98] sm:$0xff] }
 0x1d9   : > { %2160 = vmatpush1.bf16.msra.mxu0 %v2159_v4  ;;  %v948_v36 = vld [vmem:[#allocation12 + $0x128] sm:$0xff]  ;;  %2190 = vmatprep.subr.bf16.mxu1 %v2189_v29  ;;  %v934_v39 = vld [vmem:[#allocation12 + $0xb8] sm:$0xff]  ;;  %v929_v40 = vld [vmem:[#allocation12 + $0x90] sm:$0xff]  ;;  %v2167_v42 = vpack.c.bf16 %v939_v28, %v935_v27 }
 0x1da   : > { %2162 = vmatprep.subr.bf16.mxu0 %v2161_v7  ;;  %v933_v41 = vld [vmem:[#allocation12 + $0xb0] sm:$0xff]  ;;  %v943_v43 = vld [vmem:[#allocation12 + $0x100] sm:$0xff]  ;;  %v2193_v45 = vpack.c.bf16 %v934_v39, %v930_v38  ;;  %v2169_v46 = vpack.c.bf16 %v948_v36, %v944_v35  ;;  %v952_v47 = vld [vmem:[#allocation12 + $0x148] sm:$0xff] }
 0x1db   : > { %v947_v44 = vld [vmem:[#allocation12 + $0x120] sm:$0xff]  ;;  %2192 = vmatpush1.bf16.msra.mxu1 %v2191_v37  ;;  %v2195_v48 = vpack.c.bf16 %v933_v41, %v929_v40  ;;  %v938_v49 = vld [vmem:[#allocation12 + $0xd8] sm:$0xff]  ;;  %v956_v51 = vld [vmem:[#allocation12 + $0x168] sm:$0xff] }
 0x1dc   : > { %v942_v50 = vld [vmem:[#allocation12 + $0xf8] sm:$0xff]  ;;  %2194 = vmatprep.subr.bf16.mxu1 %v2193_v45  ;;  %v937_v53 = vld [vmem:[#allocation12 + $0xd0] sm:$0xff]  ;;  %v2171_v55 = vpack.c.bf16 %v947_v44, %v943_v43  ;;  %v2173_v58 = vpack.c.bf16 %v956_v51, %v952_v47  ;;  %v951_v59 = vld [vmem:[#allocation12 + $0x140] sm:$0xff] }
 0x1dd   : > { %2164 = vmatpush1.bf16.msra.mxu0 %v2163_v17  ;;  %v2197_v52 = vpack.c.bf16 %v942_v50, %v938_v49  ;;  %v941_v54 = vld [vmem:[#allocation12 + $0xf0] sm:$0xff]  ;;  %v946_v56 = vld [vmem:[#allocation12 + $0x118] sm:$0xff]  ;;  %v955_v60 = vld [vmem:[#allocation12 + $0x160] sm:$0xff] }
 0x1de   : > { %2166 = vmatprep.subr.bf16.mxu0 %v2165_v26  ;;  %v950_v57 = vld [vmem:[#allocation12 + $0x138] sm:$0xff]  ;;  %v960_v61 = vld [vmem:[#allocation12 + $0x188] sm:$0xff]  ;;  %v2199_v62 = vpack.c.bf16 %v941_v54, %v937_v53  ;;  %v945_v1 = vld [vmem:[#allocation12 + $0x110] sm:$0xff]  ;;  %v2175_v5 = vpack.c.bf16 %v955_v60, %v951_v59 }
 0x1df   : > { %2196 = vmatpush1.bf16.msra.mxu1 %v2195_v48  ;;  %v964_v63 = vld [vmem:[#allocation12 + $0x1a8] sm:$0xff]  ;;  %v2201_v0 = vpack.c.bf16 %v950_v57, %v946_v56  ;;  %v949_v2 = vld [vmem:[#allocation12 + $0x130] sm:$0xff]  ;;  %v954_v3 = vld [vmem:[#allocation12 + $0x158] sm:$0xff] }
 0x1e0   : > { %2198 = vmatprep.subr.bf16.mxu1 %v2197_v52  ;;  %v958_v4 = vld [vmem:[#allocation12 + $0x178] sm:$0xff]  ;;  %v2177_v6 = vpack.c.bf16 %v964_v63, %v960_v61  ;;  %v959_v7 = vld [vmem:[#allocation12 + $0x180] sm:$0xff]  ;;  %v968_v10 = vld [vmem:[#allocation12 + $0x1c8] sm:$0xff]  ;;  %v2203_v11 = vpack.c.bf16 %v949_v2, %v945_v1 }
 0x1e1   : > { %2168 = vmatpush1.bf16.msra.mxu0 %v2167_v42  ;;  %v963_v9 = vld [vmem:[#allocation12 + $0x1a0] sm:$0xff]  ;;  %v972_v12 = vld [vmem:[#allocation12 + $0x1e8] sm:$0xff]  ;;  %v2205_v13 = vpack.c.bf16 %v958_v4, %v954_v3  ;;  %v953_v14 = vld [vmem:[#allocation12 + $0x150] sm:$0xff] }
 0x1e2   : > { %2170 = vmatprep.subr.bf16.mxu0 %v2169_v46  ;;  %v957_v15 = vld [vmem:[#allocation12 + $0x170] sm:$0xff]  ;;  %v962_v16 = vld [vmem:[#allocation12 + $0x198] sm:$0xff]  ;;  %v2179_v22 = vpack.c.bf16 %v963_v9, %v959_v7  ;;  %v2181_v23 = vpack.c.bf16 %v972_v12, %v968_v10  ;;  %v967_v25 = vld [vmem:[#allocation12 + $0x1c0] sm:$0xff] }
 0x1e3   : > { %2200 = vmatpush1.bf16.msra.mxu1 %v2199_v62  ;;  %v966_v17 = vld [vmem:[#allocation12 + $0x1b8] sm:$0xff]  ;;  %v971_v26 = vld [vmem:[#allocation12 + $0x1e0] sm:$0xff]  ;;  %v2207_v27 = vpack.c.bf16 %v957_v15, %v953_v14  ;;  %v961_v28 = vld [vmem:[#allocation12 + $0x190] sm:$0xff] }
 0x1e4   : > { %2202 = vmatprep.subr.bf16.mxu1 %v2201_v0  ;;  %v2209_v29 = vpack.c.bf16 %v966_v17, %v962_v16  ;;  %v965_v34 = vld [vmem:[#allocation12 + $0x1b0] sm:$0xff]  ;;  %v1211_v35 = vld [vmem:[#allocation16 + $0x8] sm:$0xff]  ;;  %v970_v37 = vld [vmem:[#allocation12 + $0x1d8] sm:$0xff]  ;;  %v2183_v39 = vpack.c.bf16 %v971_v26, %v967_v25 }
 0x1e5   : > { %2172 = vmatpush1.bf16.msra.mxu0 %v2171_v55  ;;  %v1215_v36 = vld [vmem:[#allocation16 + $0x28] sm:$0xff]  ;;  %v974_v38 = vld [vmem:[#allocation12 + $0x1f8] sm:$0xff]  ;;  %v2211_v40 = vpack.c.bf16 %v965_v34, %v961_v28  ;;  %v969_v41 = vld [vmem:[#allocation12 + $0x1d0] sm:$0xff] }
 0x1e6   : > { %2174 = vmatprep.subr.bf16.mxu0 %v2173_v58  ;;  %v2217_v42 = vpack.c.bf16 %v1215_v36, %v1211_v35  ;;  %v1210_v43 = vld [vmem:[#allocation16] sm:$0xff]  ;;  %v2213_v45 = vpack.c.bf16 %v974_v38, %v970_v37  ;;  %v973_v46 = vld [vmem:[#allocation12 + $0x1f0] sm:$0xff]  ;;  %v1219_v47 = vld [vmem:[#allocation16 + $0x48] sm:$0xff] }
 0x1e7   : > { %2204 = vmatpush1.bf16.msra.mxu1 %v2203_v11  ;;  %v1214_v44 = vld [vmem:[#allocation16 + $0x20] sm:$0xff]  ;;  %v1223_v48 = vld [vmem:[#allocation16 + $0x68] sm:$0xff]  ;;  %v1213_v49 = vld [vmem:[#allocation16 + $0x18] sm:$0xff]  ;;  %v2215_v53 = vpack.c.bf16 %v973_v46, %v969_v41 }
 0x1e8   : > { %2206 = vmatprep.subr.bf16.mxu1 %v2205_v13  ;;  %v1217_v50 = vld [vmem:[#allocation16 + $0x38] sm:$0xff]  ;;  %v910_v51 = vld [vmem:[#allocation2] sm:$0xff]  ;;  %v2219_v52 = vpack.c.bf16 %v1214_v44, %v1210_v43  ;;  %v2221_v55 = vpack.c.bf16 %v1223_v48, %v1219_v47  ;;  %v1218_v56 = vld [vmem:[#allocation16 + $0x40] sm:$0xff] }
 0x1e9   : > { %2176 = vmatpush1.bf16.msra.mxu0 %v2175_v5  ;;  %v1212_v54 = vld [vmem:[#allocation16 + $0x10] sm:$0xff]  ;;  %v1222_v57 = vld [vmem:[#allocation16 + $0x60] sm:$0xff]  ;;  %v2249_v58 = vpack.c.bf16 %v1217_v50, %v1213_v49  ;;  %v1227_v60 = vld [vmem:[#allocation16 + $0x88] sm:$0xff] }
 0x1ea   : > { %2178 = vmatprep.subr.bf16.mxu0 %v2177_v6  ;;  %v1216_v59 = vld [vmem:[#allocation16 + $0x30] sm:$0xff]  ;;  %v1231_v61 = vld [vmem:[#allocation16 + $0xa8] sm:$0xff]  ;;  %v1221_v62 = vld [vmem:[#allocation16 + $0x58] sm:$0xff]  ;;  %v2223_v0 = vpack.c.bf16 %v1222_v57, %v1218_v56 }
 0x1eb   : > { %2208 = vmatpush1.bf16.msra.mxu1 %v2207_v27  ;;  %v1225_v63 = vld [vmem:[#allocation16 + $0x78] sm:$0xff]  ;;  %v2251_v1 = vpack.c.bf16 %v1216_v59, %v1212_v54  ;;  %v1220_v2 = vld [vmem:[#allocation16 + $0x50] sm:$0xff]  ;;  %v2225_v3 = vpack.c.bf16 %v1231_v61, %v1227_v60  ;;  %v1226_v4 = vld [vmem:[#allocation16 + $0x80] sm:$0xff] }
 0x1ec   : > { %2210 = vmatprep.subr.bf16.mxu1 %v2209_v29  ;;  %v1230_v5 = vld [vmem:[#allocation16 + $0xa0] sm:$0xff]  ;;  %v2253_v6 = vpack.c.bf16 %v1225_v63, %v1221_v62  ;;  %v1224_v7 = vld [vmem:[#allocation16 + $0x70] sm:$0xff]  ;;  %v1235_v9 = vld [vmem:[#allocation16 + $0xc8] sm:$0xff] }
 0x1ed   : > { %2180 = vmatpush1.bf16.msra.mxu0 %v2179_v22  ;;  %v1239_v10 = vld [vmem:[#allocation16 + $0xe8] sm:$0xff]  ;;  %v1229_v11 = vld [vmem:[#allocation16 + $0x98] sm:$0xff]  ;;  %v2227_v13 = vpack.c.bf16 %v1230_v5, %v1226_v4  ;;  %v2255_v14 = vpack.c.bf16 %v1224_v7, %v1220_v2  ;;  %v1228_v15 = vld [vmem:[#allocation16 + $0x90] sm:$0xff] }
 0x1ee   : > { %2182 = vmatprep.subr.bf16.mxu0 %v2181_v23  ;;  %v1233_v12 = vld [vmem:[#allocation16 + $0xb8] sm:$0xff]  ;;  %v2229_v16 = vpack.c.bf16 %v1239_v10, %v1235_v9  ;;  %v1234_v17 = vld [vmem:[#allocation16 + $0xc0] sm:$0xff]  ;;  %v1232_v25 = vld [vmem:[#allocation16 + $0xb0] sm:$0xff] }
 0x1ef   : > { %2212 = vmatpush1.bf16.msra.mxu1 %v2211_v40  ;;  %v1238_v22 = vld [vmem:[#allocation16 + $0xe0] sm:$0xff]  ;;  %v2257_v23 = vpack.c.bf16 %v1233_v12, %v1229_v11  ;;  %v1243_v26 = vld [vmem:[#allocation16 + $0x108] sm:$0xff]  ;;  %v1237_v28 = vld [vmem:[#allocation16 + $0xd8] sm:$0xff]  ;;  %v2259_v35 = vpack.c.bf16 %v1232_v25, %v1228_v15 }
 0x1f0   : > { %2214 = vmatprep.subr.bf16.mxu1 %v2213_v45  ;;  %v1247_v27 = vld [vmem:[#allocation16 + $0x128] sm:$0xff]  ;;  %v1241_v29 = vld [vmem:[#allocation16 + $0xf8] sm:$0xff]  ;;  %v2231_v34 = vpack.c.bf16 %v1238_v22, %v1234_v17  ;;  %v1236_v38 = vld [vmem:[#allocation16 + $0xd0] sm:$0xff] }
 0x1f1   : > { %2184 = vmatpush1.bf16.msra.mxu0 %v2183_v39  ;;  %v2233_v36 = vpack.c.bf16 %v1247_v27, %v1243_v26  ;;  %v2261_v37 = vpack.c.bf16 %v1241_v29, %v1237_v28  ;;  %v1240_v39 = vld [vmem:[#allocation16 + $0xf0] sm:$0xff]  ;;  %v1245_v40 = vld [vmem:[#allocation16 + $0x118] sm:$0xff]  ;;  %v1242_v44 = vld [vmem:[#allocation16 + $0x100] sm:$0xff] }
 0x1f2   : > { %2218 = vmatprep.subr.bf16.mxu0 %v2217_v42  ;;  %v1249_v41 = vld [vmem:[#allocation16 + $0x138] sm:$0xff]  ;;  %v2263_v42 = vpack.c.bf16 %v1240_v39, %v1236_v38  ;;  %v1246_v45 = vld [vmem:[#allocation16 + $0x120] sm:$0xff]  ;;  %v1244_v46 = vld [vmem:[#allocation16 + $0x110] sm:$0xff] }
 0x1f3   : > { %2216 = vmatpush1.bf16.msra.mxu1 %v2215_v53  ;;  %v2265_v43 = vpack.c.bf16 %v1249_v41, %v1245_v40  ;;  %v2235_v47 = vpack.c.bf16 %v1246_v45, %v1242_v44  ;;  %v1248_v48 = vld [vmem:[#allocation16 + $0x130] sm:$0xff]  ;;  %v1251_v50 = vld [vmem:[#allocation16 + $0x148] sm:$0xff]  ;;  %v1257_v54 = vld [vmem:[#allocation16 + $0x178] sm:$0xff] }
 0x1f4   : > { %1040 = vmatmul.mubr.f32.vlgmr.msra.gmra.mrb[0].mxu0 %v910_v51  ;;  %2250 = vmatprep.subr.bf16.mxu1 %v2249_v58  ;;  %v2267_v49 = vpack.c.bf16 %v1248_v48, %v1244_v46  ;;  %v1254_v56 = vld [vmem:[#allocation16 + $0x160] sm:$0xff]  ;;  %v1252_v59 = vld [vmem:[#allocation16 + $0x150] sm:$0xff]  ;;  %v1259_v62 = vld [vmem:[#allocation16 + $0x188] sm:$0xff] }
 0x1f5   : > { %2220 = vmatpush1.bf16.msra.mxu0 %v2219_v52  ;;  %1338 = vmatprep.mubr.f32.mxu0 %v3129_v24  ;;  %v1253_v52 = vld [vmem:[#allocation16 + $0x158] sm:$0xff]  ;;  %v1256_v60 = vld [vmem:[#allocation16 + $0x170] sm:$0xff]  ;;  %v1263_v63 = vld [vmem:[#allocation16 + $0x1a8] sm:$0xff] }
 0x1f6   : > { %2222 = vmatprep.subr.bf16.mxu0 %v2221_v55  ;;  %1111 = vmatmul.mubr.f32.vlgmr.msra.gmra.mrb[0].mxu1 %v910_v51  ;;  %v1255_v51 = vld [vmem:[#allocation16 + $0x168] sm:$0xff]  ;;  %v1250_v55 = vld [vmem:[#allocation16 + $0x140] sm:$0xff]  ;;  %v2269_v57 = vpack.c.bf16 %v1257_v54, %v1253_v52  ;;  %v2271_v61 = vpack.c.bf16 %v1256_v60, %v1252_v59  ;;  %v1265_v2 = vld [vmem:[#allocation16 + $0x1b8] sm:$0xff] }
 0x1f7   : > { %2252 = vmatpush1.bf16.msra.mxu1 %v2251_v1  ;;  %1409 = vmatprep.mubr.f32.mxu1 %v3129_v24  ;;  %v2237_v53 = vpack.c.bf16 %v1255_v51, %v1251_v50  ;;  %v2239_v58 = vpack.c.bf16 %v1254_v56, %v1250_v55  ;;  %v2241_v1 = vpack.c.bf16 %v1263_v63, %v1259_v62  ;;  %v1262_v4 = vld [vmem:[#allocation16 + $0x1a0] sm:$0xff]  ;;  %v1260_v7 = vld [vmem:[#allocation16 + $0x190] sm:$0xff]  ;;  %v1267_v11 = vld [vmem:[#allocation16 + $0x1c8] sm:$0xff] }
 0x1f8   : > { %2254 = vmatprep.subr.bf16.mxu1 %v2253_v6  ;;  %v1264_v9 = vld [vmem:[#allocation16 + $0x1b0] sm:$0xff]  ;;  %v1271_v12 = vld [vmem:[#allocation16 + $0x1e8] sm:$0xff]  ;;  %v1273_v15 = vld [vmem:[#allocation16 + $0x1f8] sm:$0xff] }
 0x1f9   : > { %2224 = vmatpush1.bf16.msra.mxu0 %v2223_v0  ;;  %v1261_v0 = vld [vmem:[#allocation16 + $0x198] sm:$0xff]  ;;  %v2275_v10 = vpack.c.bf16 %v1264_v9, %v1260_v7  ;;  %v1270_v17 = vld [vmem:[#allocation16 + $0x1e0] sm:$0xff]  ;;  %v1268_v25 = vld [vmem:[#allocation16 + $0x1d0] sm:$0xff] }
 0x1fa   : > { %2226 = vmatprep.subr.bf16.mxu0 %v2225_v3  ;;  %v1258_v3 = vld [vmem:[#allocation16 + $0x180] sm:$0xff]  ;;  %v2273_v5 = vpack.c.bf16 %v1265_v2, %v1261_v0  ;;  %v1272_v26 = vld [vmem:[#allocation16 + $0x1f0] sm:$0xff]  ;;  %v1145_v28 = vld [vmem:[#allocation15 + $0x8] sm:$0xff] }
 0x1fb   : > { %2256 = vmatpush1.bf16.msra.mxu1 %v2255_v14  ;;  %v2243_v6 = vpack.c.bf16 %v1262_v4, %v1258_v3  ;;  %v2245_v14 = vpack.c.bf16 %v1271_v12, %v1267_v11  ;;  %v2279_v27 = vpack.c.bf16 %v1272_v26, %v1268_v25  ;;  %v1149_v29 = vld [vmem:[#allocation15 + $0x28] sm:$0xff]  ;;  %v1148_v38 = vld [vmem:[#allocation15 + $0x20] sm:$0xff]  ;;  %v1146_v41 = vld [vmem:[#allocation15 + $0x10] sm:$0xff] }
 0x1fc   : > { %2258 = vmatprep.subr.bf16.mxu1 %v2257_v23  ;;  %v1153_v45 = vld [vmem:[#allocation15 + $0x48] sm:$0xff]  ;;  %v1152_v50 = vld [vmem:[#allocation15 + $0x40] sm:$0xff]  ;;  %v1154_v54 = vld [vmem:[#allocation15 + $0x50] sm:$0xff] }
 0x1fd   : > { %2228 = vmatpush1.bf16.msra.mxu0 %v2227_v13  ;;  %v1269_v13 = vld [vmem:[#allocation16 + $0x1d8] sm:$0xff]  ;;  %v1157_v46 = vld [vmem:[#allocation15 + $0x68] sm:$0xff]  ;;  %v1156_v51 = vld [vmem:[#allocation15 + $0x60] sm:$0xff] }
 0x1fe   : > { %2230 = vmatprep.subr.bf16.mxu0 %v2229_v16  ;;  %v1266_v16 = vld [vmem:[#allocation16 + $0x1c0] sm:$0xff]  ;;  %v2277_v22 = vpack.c.bf16 %v1273_v15, %v1269_v13  ;;  %v2285_v48 = vpack.c.bf16 %v1157_v46, %v1153_v45  ;;  %v1158_v55 = vld [vmem:[#allocation15 + $0x70] sm:$0xff]  ;;  %v1163_v59 = vld [vmem:[#allocation15 + $0x98] sm:$0xff] }
 0x1ff   : > { %2260 = vmatpush1.bf16.msra.mxu1 %v2259_v35  ;;  %v2247_v23 = vpack.c.bf16 %v1270_v17, %v1266_v16  ;;  %v2281_v35 = vpack.c.bf16 %v1149_v29, %v1145_v28  ;;  %v2319_v56 = vpack.c.bf16 %v1158_v55, %v1154_v54  ;;  %v1160_v62 = vld [vmem:[#allocation15 + $0x80] sm:$0xff]  ;;  %v1162_v2 = vld [vmem:[#allocation15 + $0x90] sm:$0xff]  ;;  %v1175_v9 = vld [vmem:[#allocation15 + $0xf8] sm:$0xff] }
 0x200   : > { %2262 = vmatprep.subr.bf16.mxu1 %v2261_v37  ;;  %v1144_v37 = vld [vmem:[#allocation15] sm:$0xff]  ;;  %v1166_v3 = vld [vmem:[#allocation15 + $0xb0] sm:$0xff]  ;;  %v1177_v17 = vld [vmem:[#allocation15 + $0x108] sm:$0xff] }
 0x201   : > { %2232 = vmatpush1.bf16.msra.mxu0 %v2231_v34  ;;  %v1147_v34 = vld [vmem:[#allocation15 + $0x18] sm:$0xff]  ;;  %v2283_v40 = vpack.c.bf16 %v1148_v38, %v1144_v37  ;;  %v1164_v63 = vld [vmem:[#allocation15 + $0xa0] sm:$0xff]  ;;  %v2323_v4 = vpack.c.bf16 %v1166_v3, %v1162_v2  ;;  %v1174_v15 = vld [vmem:[#allocation15 + $0xf0] sm:$0xff] }
 0x202   : > { %2234 = vmatprep.subr.bf16.mxu0 %v2233_v36  ;;  %v1151_v36 = vld [vmem:[#allocation15 + $0x38] sm:$0xff]  ;;  %v1172_v11 = vld [vmem:[#allocation15 + $0xe0] sm:$0xff]  ;;  %v1185_v38 = vld [vmem:[#allocation15 + $0x148] sm:$0xff] }
 0x203   : > { %2264 = vmatpush1.bf16.msra.mxu1 %v2263_v42  ;;  %v2313_v39 = vpack.c.bf16 %v1151_v36, %v1147_v34  ;;  %v1150_v42 = vld [vmem:[#allocation15 + $0x30] sm:$0xff]  ;;  %v1183_v26 = vld [vmem:[#allocation15 + $0x138] sm:$0xff]  ;;  %v1180_v28 = vld [vmem:[#allocation15 + $0x120] sm:$0xff] }
 0x204   : > { %2266 = vmatprep.subr.bf16.mxu1 %v2265_v43  ;;  %v1209_v43 = vld [vmem:[#allocation7 + $0x8] sm:$0xff]  ;;  %v2315_v44 = vpack.c.bf16 %v1150_v42, %v1146_v41  ;;  %v1182_v36 = vld [vmem:[#allocation15 + $0x130] sm:$0xff]  ;;  %v1191_v42 = vld [vmem:[#allocation15 + $0x178] sm:$0xff] }
 0x205   : > { %2236 = vmatpush1.bf16.msra.mxu0 %v2235_v47  ;;  %v1155_v47 = vld [vmem:[#allocation15 + $0x58] sm:$0xff]  ;;  %v1200_v3 = vld [vmem:[#allocation15 + $0x1c0] sm:$0xff] }
 0x206   : > { %2238 = vmatprep.subr.bf16.mxu0 %v2237_v53  ;;  %v2287_v53 = vpack.c.bf16 %v1156_v51, %v1152_v50  ;;  %v1197_v51 = vld [vmem:[#allocation15 + $0x1a8] sm:$0xff]  ;;  %v1207_v2 = vld [vmem:[#allocation15 + $0x1f8] sm:$0xff] }
 0x207   : > { %2268 = vmatpush1.bf16.msra.mxu1 %v2267_v49  ;;  %v1159_v49 = vld [vmem:[#allocation15 + $0x78] sm:$0xff] }
 0x208   : > { %2270 = vmatprep.subr.bf16.mxu1 %v2269_v57  ;;  %v2317_v52 = vpack.c.bf16 %v1159_v49, %v1155_v47  ;;  %v1161_v57 = vld [vmem:[#allocation15 + $0x88] sm:$0xff]  ;;  %v1186_v47 = vld [vmem:[#allocation15 + $0x150] sm:$0xff] }
 0x209   : > { %2240 = vmatpush1.bf16.msra.mxu0 %v2239_v58  ;;  %v1165_v58 = vld [vmem:[#allocation15 + $0xa8] sm:$0xff] }
 0x20a   : > { %2242 = vmatprep.subr.bf16.mxu0 %v2241_v1  ;;  %v2289_v60 = vpack.c.bf16 %v1165_v58, %v1161_v57  ;;  %v2291_v1 = vpack.c.bf16 %v1164_v63, %v1160_v62  ;;  %v1193_v49 = vld [vmem:[#allocation15 + $0x188] sm:$0xff]  ;;  %v1196_v57 = vld [vmem:[#allocation15 + $0x1a0] sm:$0xff]  ;;  %v1194_v58 = vld [vmem:[#allocation15 + $0x190] sm:$0xff] }
 0x20b   : > { %2272 = vmatpush1.bf16.msra.mxu1 %v2271_v61  ;;  %v1167_v61 = vld [vmem:[#allocation15 + $0xb8] sm:$0xff]  ;;  %v2305_v54 = vpack.c.bf16 %v1197_v51, %v1193_v49  ;;  %v1205_v62 = vld [vmem:[#allocation15 + $0x1e8] sm:$0xff] }
 0x20c   : > { %2274 = vmatprep.subr.bf16.mxu1 %v2273_v5  ;;  %v2321_v0 = vpack.c.bf16 %v1167_v61, %v1163_v59  ;;  %v1169_v5 = vld [vmem:[#allocation15 + $0xc8] sm:$0xff] }
 0x20d   : > { %2244 = vmatpush1.bf16.msra.mxu0 %v2243_v6  ;;  %v1173_v6 = vld [vmem:[#allocation15 + $0xe8] sm:$0xff] }
 0x20e   : > { %2246 = vmatprep.subr.bf16.mxu0 %v2245_v14  ;;  %v2293_v7 = vpack.c.bf16 %v1173_v6, %v1169_v5  ;;  %v1170_v14 = vld [vmem:[#allocation15 + $0xd0] sm:$0xff]  ;;  %v1201_v61 = vld [vmem:[#allocation15 + $0x1c8] sm:$0xff]  ;;  %v1204_v5 = vld [vmem:[#allocation15 + $0x1e0] sm:$0xff] }
 0x20f   : > { %2276 = vmatpush1.bf16.msra.mxu1 %v2275_v10  ;;  %v1168_v10 = vld [vmem:[#allocation15 + $0xc0] sm:$0xff]  ;;  %v2327_v16 = vpack.c.bf16 %v1174_v15, %v1170_v14  ;;  %v1202_v6 = vld [vmem:[#allocation15 + $0x1d0] sm:$0xff] }
 0x210   : > { %2278 = vmatprep.subr.bf16.mxu1 %v2277_v22  ;;  %v2295_v13 = vpack.c.bf16 %v1172_v11, %v1168_v10  ;;  %v1181_v22 = vld [vmem:[#allocation15 + $0x128] sm:$0xff] }
 0x211   : > { %2248 = vmatpush1.bf16.msra.mxu0 %v2247_v23  ;;  %v1179_v23 = vld [vmem:[#allocation15 + $0x118] sm:$0xff]  ;;  %v2297_v25 = vpack.c.bf16 %v1181_v22, %v1177_v17 }
 0x212   : > { %2282 = vmatprep.subr.bf16.mxu0 %v2281_v35  ;;  %v2329_v29 = vpack.c.bf16 %v1183_v26, %v1179_v23  ;;  %v1178_v35 = vld [vmem:[#allocation15 + $0x110] sm:$0xff] }
 0x213   : > { %2280 = vmatpush1.bf16.msra.mxu1 %v2279_v27  ;;  %v1176_v27 = vld [vmem:[#allocation15 + $0x100] sm:$0xff]  ;;  %v2331_v37 = vpack.c.bf16 %v1182_v36, %v1178_v35 }
 0x214   : > { %2314 = vmatprep.subr.bf16.mxu1 %v2313_v39  ;;  %1339 = vmatmul.mubr.f32.vlgmr.msra.gmra.mrb[2].mxu0 %v1209_v43  ;;  %v2299_v34 = vpack.c.bf16 %v1180_v28, %v1176_v27  ;;  %v1189_v39 = vld [vmem:[#allocation15 + $0x168] sm:$0xff] }
 0x215   : > { %2284 = vmatpush1.bf16.msra.mxu0 %v2283_v40  ;;  %1480 = vmatprep.mubr.f32.mxu0 %v3129_v24  ;;  %v1187_v40 = vld [vmem:[#allocation15 + $0x158] sm:$0xff]  ;;  %v2301_v41 = vpack.c.bf16 %v1189_v39, %v1185_v38 }
 0x216   : > { %1410 = vmatmul.mubr.f32.vlgmr.msra.gmra.mrb[2].mxu1 %v1209_v43  ;;  %2286 = vmatprep.subr.bf16.mxu0 %v2285_v48  ;;  %v1184_v43 = vld [vmem:[#allocation15 + $0x140] sm:$0xff]  ;;  %v2333_v45 = vpack.c.bf16 %v1191_v42, %v1187_v40  ;;  %v1190_v48 = vld [vmem:[#allocation15 + $0x170] sm:$0xff] }
 0x217   : > { %2316 = vmatpush1.bf16.msra.mxu1 %v2315_v44  ;;  %1551 = vmatprep.mubr.f32.mxu1 %v3129_v24  ;;  %v1171_v24 = vld [vmem:[#allocation15 + $0xd8] sm:$0xff]  ;;  %v1188_v44 = vld [vmem:[#allocation15 + $0x160] sm:$0xff]  ;;  %v2335_v50 = vpack.c.bf16 %v1190_v48, %v1186_v47  ;;  %v1558_v42 = vld [vmem:[%s3977_s5] sm:$0xf] }
 0x218   : > { %2318 = vmatprep.subr.bf16.mxu1 %v2317_v52  ;;  %v2325_v12 = vpack.c.bf16 %v1175_v9, %v1171_v24  ;;  %v2303_v46 = vpack.c.bf16 %v1188_v44, %v1184_v43  ;;  %v1195_v52 = vld [vmem:[#allocation15 + $0x198] sm:$0xff]  ;;  %v1206_v24 = vld [vmem:[#allocation15 + $0x1f0] sm:$0xff]  ;;  %v1563_v43 = vrot.slane %v1558_v42, %v733_v18  ;;  %v1567_v44 = vrot.slane %v1558_v42, %v737_v19 }
 0x219   : > { %2288 = vmatpush1.bf16.msra.mxu0 %v2287_v53  ;;  %v1199_v53 = vld [vmem:[#allocation15 + $0x1b8] sm:$0xff]  ;;  %v2343_v9 = vpack.c.bf16 %v1206_v24, %v1202_v6  ;;  %v1571_v18 = vrot.slane %v1558_v42, %v741_v20 }
 0x21a   : > { %2290 = vmatprep.subr.bf16.mxu0 %v2289_v60  ;;  %v2337_v55 = vpack.c.bf16 %v1199_v53, %v1195_v52  ;;  %v1198_v60 = vld [vmem:[#allocation15 + $0x1b0] sm:$0xff]  ;;  %v1575_v53 = vrot.slane %v1558_v42, %v745_v21 }
 0x21b   : > { %2320 = vmatpush1.bf16.msra.mxu1 %v2319_v56  ;;  %v1192_v56 = vld [vmem:[#allocation15 + $0x180] sm:$0xff]  ;;  %v2339_v63 = vpack.c.bf16 %v1198_v60, %v1194_v58 }
 0x21c   : > { %2322 = vmatprep.subr.bf16.mxu1 %v2321_v0  ;;  %v2307_v59 = vpack.c.bf16 %v1196_v57, %v1192_v56  ;;  %v2309_v0 = vpack.c.bf16 %v1205_v62, %v1201_v61  ;;  %v1604_v62 = vld [vmem:[#allocation10 + $0x8] sm:$0xff] }
 0x21d   : > { %2292 = vmatpush1.bf16.msra.mxu0 %v2291_v1  ;;  %v1203_v1 = vld [vmem:[#allocation15 + $0x1d8] sm:$0xff] }
 0x21e   : > { %2294 = vmatprep.subr.bf16.mxu0 %v2293_v7  ;;  %v2311_v7 = vpack.c.bf16 %v1204_v5, %v1200_v3 }
 0x21f   : > { %2324 = vmatpush1.bf16.msra.mxu1 %v2323_v4  ;;  %v2341_v4 = vpack.c.bf16 %v1207_v2, %v1203_v1 }
 0x220   : > { %2326 = vmatprep.subr.bf16.mxu1 %v2325_v12 }
 0x221   : > { %2296 = vmatpush1.bf16.msra.mxu0 %v2295_v13 }
 0x222   : > { %2298 = vmatprep.subr.bf16.mxu0 %v2297_v25 }
 0x223   : > { %2328 = vmatpush1.bf16.msra.mxu1 %v2327_v16 }
 0x224   : > { %2330 = vmatprep.subr.bf16.mxu1 %v2329_v29 }
 0x225   : > { %2300 = vmatpush1.bf16.msra.mxu0 %v2299_v34  ;;  %v1136_v34 = vld [vmem:[#allocation10] sm:$0xff] }
 0x226   : > { %2302 = vmatprep.subr.bf16.mxu0 %v2301_v41 }
 0x227   : > { %2332 = vmatpush1.bf16.msra.mxu1 %v2331_v37 }
 0x228   : > { %2334 = vmatprep.subr.bf16.mxu1 %v2333_v45 }
 0x229   : > { %2304 = vmatpush1.bf16.msra.mxu0 %v2303_v46 }
 0x22a   : > { %2306 = vmatprep.subr.bf16.mxu0 %v2305_v54 }
 0x22b   : > { %2336 = vmatpush1.bf16.msra.mxu1 %v2335_v50 }
 0x22c   : > { %2338 = vmatprep.subr.bf16.mxu1 %v2337_v55 }
 0x22d   : > { %2308 = vmatpush1.bf16.msra.mxu0 %v2307_v59 }
 0x22e   : > { %2310 = vmatprep.subr.bf16.mxu0 %v2309_v0 }
 0x22f   : > { %2340 = vmatpush1.bf16.msra.mxu1 %v2339_v63 }
 0x230   : > { %2342 = vmatprep.subr.bf16.mxu1 %v2341_v4 }
 0x231   : > { %2312 = vmatpush1.bf16.msra.mxu0 %v2311_v7 }
 0x233   : > { %2344 = vmatpush1.bf16.msra.mxu1 %v2343_v9 }
 0x2c7   : > { %v1041_v10 = vpop.f32.mrb[0].mxu0 }
 0x2c8   : > { %v2369_v11 = vadd.f32 %v1041_v10, %v3558_v30  ;;  %v1043_v12 = vpop.f32.mrb[1].mxu0 }
 0x2c9   : > { %v2370_v13 = vadd.f32 %v1043_v12, %v3562_v31  ;;  %v1112_v16 = vpop.f32.mrb[0].mxu1 }
 0x2ca   : > { %v2014_v14 = vmul.f32 -1.442695, %v2369_v11  ;;  %v1114_v17 = vpop.f32.mrb[1].mxu1  ;;  %v2371_v25 = vadd.f32 %v1112_v16, %v3566_v32 }
 0x2cb   : > { %v2015_v15 = vmul.f32 -1.442695, %v2370_v13  ;;  %v2372_v22 = vadd.f32 %v1114_v17, %v3570_v33 }
 0x2cc   : > { %2522 = vpow2.f32 %v2014_v14 }
 0x2cd   : > { %2524 = vpow2.f32 %v2015_v15  ;;  %v2016_v23 = vmul.f32 -1.442695, %v2372_v22 }
 0x2cf   : > { %2526 = vpow2.f32 %v2016_v23 }
 0x2d0   : > { %2528 = vtanh.f32 %v2371_v25 }
 0x2d6   : > { %v2523_v26 = vpop.eup %2522 }
 0x2d7   : > { %v2525_v27 = vpop.eup %2524  ;;  %v1120_v28 = vadd.f32 1.0, %v2523_v26 }
 0x2d8   : > { %v1126_v30 = vadd.f32 1.0, %v2525_v27 }
 0x2d9   : > { %2530 = vrcp.f32 %v1120_v28  ;;  %v2527_v31 = vpop.eup %2526 }
 0x2da   : > { %2532 = vrcp.f32 %v1126_v30  ;;  %v2529_v29 = vpop.eup %2528  ;;  %v1133_v36 = vadd.f32 1.0, %v2527_v31 }
 0x2dc   : > { %2534 = vrcp.f32 %v1133_v36 }
 0x2e3   : > { %v2531_v35 = vpop.eup %2530 }
 0x2e4   : > { %v2533_v37 = vpop.eup %2532  ;;  %v1138_v38 = vmul.f32 %v2531_v35, %v2529_v29 }
 0x2e5   : > { %v1137_v39 = vmul.f32 %v2533_v37, %v1136_v34 }
 0x2e6   : > { %v2535_v32 = vpop.eup %2534 }
 0x2e7   : > { %v1139_v33 = vadd.f32 %v1138_v38, %v1137_v39 }
 0x2e9   : > { %2536 = vtanh.f32 %v1139_v33  ;;  %1143 = vst [vmem:[#allocation22] sm:$0xff] %v1139_v33 }
 0x2f3   : > { %v2537_v40 = vpop.eup %2536 }
 0x2f4   : > { %v1141_v41 = vmul.f32 %v2537_v40, %v2535_v32 }
 0x2f6   : > { %1142 = vst [vmem:[#allocation20] sm:$0xff] %v1141_v41  ;;  %1481 = vmatmul.mubr.f32.vlgmr.msra.gmra.mrb[2].mxu0 %v1141_v41  ;;  %1552 = vmatmul.mubr.f32.vlgmr.msra.gmra.mrb[2].mxu1 %v1141_v41 }
 0x3c9   : > { %v1482_v45 = vpop.f32.mrb[2].mxu0  ;;  %v1553_v46 = vpop.f32.mrb[2].mxu1 }
 0x3ca   : > { %v1580_v47 = vadd.f32 %v1563_v43, %v1482_v45  ;;  %v1484_v48 = vpop.f32.mrb[3].mxu0  ;;  %v1555_v49 = vpop.f32.mrb[3].mxu1  ;;  %v1582_v56 = vadd.f32 %v1571_v18, %v1553_v46 }
 0x3cb   : > { %v1581_v50 = vadd.f32 %v1567_v44, %v1484_v48  ;;  %v1583_v54 = vadd.f32 %v1575_v53, %v1555_v49 }
 0x3cc   : > { %v2017_v51 = vmul.f32 -1.442695, %v1580_v47 }
 0x3cd   : > { %v2018_v52 = vmul.f32 -1.442695, %v1581_v50  ;;  %v2019_v55 = vmul.f32 -1.442695, %v1583_v54 }
 0x3ce   : > { %2538 = vpow2.f32 %v2017_v51 }
 0x3cf   : > { %2540 = vpow2.f32 %v2018_v52 }
 0x3d0   : > { %2542 = vpow2.f32 %v2019_v55 }
 0x3d1   : > { %2544 = vtanh.f32 %v1582_v56 }
 0x3d8   : > { %v2539_v19 = vpop.eup %2538 }
 0x3d9   : > { %v2541_v57 = vpop.eup %2540  ;;  %v1587_v58 = vadd.f32 1.0, %v2539_v19 }
 0x3da   : > { %v1593_v59 = vadd.f32 1.0, %v2541_v57  ;;  %v2543_v60 = vpop.eup %2542 }
 0x3db   : > { %2546 = vrcp.f32 %v1587_v58  ;;  %v2545_v61 = vpop.eup %2544  ;;  %v1600_v1 = vadd.f32 1.0, %v2543_v60 }
 0x3dc   : > { %2548 = vrcp.f32 %v1593_v59 }
 0x3dd   : > { %2550 = vrcp.f32 %v1600_v1 }
 0x3e5   : > { %v2547_v21 = vpop.eup %2546 }
 0x3e6   : > { %v2549_v63 = vpop.eup %2548  ;;  %v1606_v0 = vmul.f32 %v2547_v21, %v2545_v61 }
 0x3e7   : > { %v1605_v2 = vmul.f32 %v2549_v63, %v1604_v62  ;;  %v2551_v20 = vpop.eup %2550 }
 0x3e9   : > { %v1607_v8 = vadd.f32 %v1606_v0, %v1605_v2 }
 0x3eb   : > { %2552 = vtanh.f32 %v1607_v8  ;;  %1613 = vst [vmem:[#allocation22 + $0x8] sm:$0xff] %v1607_v8 }
 0x3f5   : > { %v2553_v3 = vpop.eup %2552 }
 0x3f6   : > { %v1609_v4 = vmul.f32 %v2553_v3, %v2551_v20 }
 0x3f8   : > { %1611 = vst [vmem:[#allocation20 + $0x8] sm:$0xff] %v1609_v4  ;;  %1614 = vst [vmem:[#allocation4] sm:$0xff] %v1609_v4 }
 0x3f9 PF: > { %v1616_v5 = vld [vmem:[%s3517_s16] sm:$0xff]  ;;  %v1617_v6 = vld [vmem:[%s3517_s16 + $0x8] sm:$0xff]  ;;  %v1618_v24 = vld [vmem:[%s3517_s16 + $0x10] sm:$0xff]  ;;  %v3136_v7 = vmov 0.0|0.0   ;;  %vm3137_vm0 = vmmov 0   ;;  %v3138_v11 = vmov 0.0  }
 0x3fa   : > { %2345 = vmatprep.subr.bf16.mxu0 %v3136_v7  ;;  %v2346_v9 = vpack.c.bf16 %v1617_v6, %v1616_v5  ;;  %v1619_v10 = vld [vmem:[%s3517_s16 + $0x18] sm:$0xff]  ;;  %2086 = vmatprep.mubr.msk.f32.mxu0 %vm3137_vm0, %v3138_v11  ;;  %v1620_v13 = vld [vmem:[%s3517_s16 + $0x20] sm:$0xff]  ;;  %v1621_v14 = vld [vmem:[%s3517_s16 + $0x28] sm:$0xff]  ;;  %s3139_s4 = smov [#allocation20]   ;;  %p3978_p2 = scmp.eq.s32.totalorder %s3243_s23, 1 }
 0x3fb   : > { %v2349_v12 = vpack.c.bf16 %v1619_v10, %v1618_v24  ;;  %v2352_v15 = vpack.c.bf16 %v1621_v14, %v1620_v13  ;;  %v1622_v16 = vld [vmem:[%s3517_s16 + $0x30] sm:$0xff]  ;;  %v1623_v17 = vld [vmem:[%s3517_s16 + $0x38] sm:$0xff]  ;;  %v1624_v23 = vld [vmem:[%s3517_s16 + $0x40] sm:$0xff]  ;;  %s1734_s6 = sshll.u32 %s3139_s4, 4  ;;  %s1735_s6 = int_to_ptr.vmem [resolvable:$true] %s1734_s6 }
 0x3fc   : > { %2347 = vmatpush3.bf16.msra.mxu0 %v2346_v9  ;;  %v2355_v22 = vpack.c.bf16 %v1623_v17, %v1622_v16  ;;  %v1625_v25 = vld [vmem:[%s3517_s16 + $0x48] sm:$0xff]  ;;  %v1626_v27 = vld [vmem:[%s3517_s16 + $0x50] sm:$0xff]  ;;  %v1627_v28 = vld [vmem:[%s3517_s16 + $0x58] sm:$0xff]  ;;  %s2956_s27 = scalar_lea.vmem %s1735_s6, 256  ;;  %p2963_p12 = scmp.lt.s32.totalorder %s1735_s6, %s1735_s6 }
 0x3fd   : > { %2348 = vmatprep.subr.bf16.mxu0 %v3136_v7  ;;  %v2358_v26 = vpack.c.bf16 %v1625_v25, %v1624_v23  ;;  %v2361_v30 = vpack.c.bf16 %v1627_v28, %v1626_v27  ;;  %v1628_v31 = vld [vmem:[%s3517_s16 + $0x60] sm:$0xff]  ;;  %v1629_v29 = vld [vmem:[%s3517_s16 + $0x68] sm:$0xff]  ;;  %v1630_v35 = vld [vmem:[%s3517_s16 + $0x70] sm:$0xff]  ;;  %p2957_p6 = scmp.ne.s32.totalorder %s1735_s6, %s2956_s27  ;;  %p2964_p5 = scmp.lt.s32.totalorder %s2956_s27, %s2956_s27 }
 0x3fe   : > { %v2364_v34 = vpack.c.bf16 %v1629_v29, %v1628_v31  ;;  %v1631_v36 = vld [vmem:[%s3517_s16 + $0x78] sm:$0xff] }
 0x3ff   : > { %v2367_v37 = vpack.c.bf16 %v1631_v36, %v1630_v35  ;;  %v1615_v38 = vld [vmem:[#allocation4] sm:$0xff]  ;;  %p2958_p4 = pnand %p2957_p6, %p3978_p2  ;;  %p2965_p0 = por %p2964_p5, %p2963_p12 }
 0x400   : > { %2350 = vmatpush3.bf16.msra.mxu0 %v2349_v12 }
 0x401   : > { %2351 = vmatprep.subr.bf16.mxu0 %v3136_v7  ;;  %p2959_p3 = pneg %p2958_p4 }
 0x403   : > { %p2966_p9 = pnand %p2965_p0, %p2959_p3 }
 0x404   : > { %2353 = vmatpush3.bf16.msra.mxu0 %v2352_v15 }
 0x405   : > { %2354 = vmatprep.subr.bf16.mxu0 %v3136_v7 }
 0x408   : > { %2356 = vmatpush3.bf16.msra.mxu0 %v2355_v22 }
 0x409   : > { %2357 = vmatprep.subr.bf16.mxu0 %v3136_v7 }
 0x40c   : > { %2359 = vmatpush3.bf16.msra.mxu0 %v2358_v26 }
 0x40d   : > { %2360 = vmatprep.subr.bf16.mxu0 %v3136_v7 }
 0x410   : > { %2362 = vmatpush3.bf16.msra.mxu0 %v2361_v30 }
 0x411   : > { %2363 = vmatprep.subr.bf16.mxu0 %v3136_v7 }
 0x414   : > { %2365 = vmatpush3.bf16.msra.mxu0 %v2364_v34 }
 0x415   : > { %2366 = vmatprep.subr.bf16.mxu0 %v3136_v7 }
 0x418   : > { %2368 = vmatpush3.bf16.msra.mxu0 %v2367_v37 }
 0x41b   : > { %2087 = vmatmul.mubr.f32.vlgmr.msra.gmra.mrb[0].mxu0 %v1615_v38 }
 0x41c   : > { %2969 = shalt.err (!%p2966_p9)
}
 0x41d   : > { %s3979_s26 = sld [smem:[#allocation68_spill]]  ;;  %p3980_p1 = pmov %p3978_p2 }
 0x423   : > { %s2970_s1 = scalar_lea.hbm %s3979_s26, 256 }
 0x424   : > { %p2971_p13 = scmp.ne.s32.totalorder %s3979_s26, %s2970_s1  ;;  %p2976_p11 = scmp.lt.u32.totalorder %s2970_s1, %s3979_s26 }
 0x426   : > { %p2972_p7 = pnand %p2971_p13, %p3980_p1 }
 0x428   : > { %p2973_p8 = pneg %p2972_p7 }
 0x42a   : > { %p2978_p10 = pnand %p2976_p11, %p2973_p8 }
 0x42c   : > { %2981 = shalt.err (!%p2978_p10)
}
 0x42d   : > { %s3140_s17 = smov 128   ;;  %s3141_s24 = smov 8  }
 0x42e   : > { %p3981_p6 = pmov %p3980_p1  ;;  %s3142_s30 = smov [#allocation22]  }
 0x42f   : > { %s1747_s5 = sshll.u32 %s3142_s30, 4  ;;  %p3982_p4 = pmov %p3980_p1  ;;  %s1748_s5 = int_to_ptr.vmem [resolvable:$true] %s1747_s5 }
 0x430   : > { %2409 = dma.vmem_to_hbm [thread:$0]  (%p3981_p6), %s1735_s6, 256, %s3979_s26, [#allocation21], %s3140_s17, %s3140_s17, %s3141_s24  }
 0x431   : > { %s2982_s4 = scalar_lea.vmem %s1748_s5, 256  ;;  %p2989_p5 = scmp.lt.s32.totalorder %s1748_s5, %s1748_s5 }
 0x432   : > { %p2983_p2 = scmp.ne.s32.totalorder %s1748_s5, %s2982_s4  ;;  %p2990_p0 = scmp.lt.s32.totalorder %s2982_s4, %s2982_s4 }
 0x434   : > { %p2984_p3 = pnand %p2983_p2, %p3982_p4  ;;  %p2991_p9 = por %p2990_p0, %p2989_p5 }
 0x436   : > { %p2985_p12 = pneg %p2984_p3 }
 0x438   : > { %p2992_p13 = pnand %p2991_p9, %p2985_p12 }
 0x43a   : > { %2995 = shalt.err (!%p2992_p13)
}
 0x43b   : > { %s3983_s3 = sld [smem:[#allocation69_spill]]  ;;  %p3984_p7 = pmov %p3982_p4 }
 0x441   : > { %s2996_s1 = scalar_lea.hbm %s3983_s3, 256 }
 0x442   : > { %p2997_p1 = scmp.ne.s32.totalorder %s3983_s3, %s2996_s1  ;;  %p3002_p10 = scmp.lt.u32.totalorder %s2996_s1, %s3983_s3 }
 0x444   : > { %p2998_p8 = pnand %p2997_p1, %p3984_p7 }
 0x446   : > { %p2999_p11 = pneg %p2998_p8 }
 0x448   : > { %p3004_p6 = pnand %p3002_p10, %p2999_p11 }
 0x44a   : > { %3007 = shalt.err (!%p3004_p6)
}
 0x44b   : > { %p3985_p2 = pmov %p3982_p4  ;;  %s3986_s4 = scalar_lea.vmem %s3920_s11, %s3526_s14 }
 0x44c   : > { %v2020_v39 = vld [vmem:[%s3986_s4] ss:$0 sm:$0xff]  ;;  %s2022_s27 = sshll.u32 %s3243_s23, 7  ;;  %s1724_s16 = sshll.u32 %s3532_s12, 4  ;;  %s3862_s16 = int_to_ptr.vmem [resolvable:$true] %s1724_s16 }
 0x44d   : > { %2411 = dma.vmem_to_hbm [thread:$0]  (%p3985_p2), %s1748_s5, 256, %s3983_s3, [#allocation21], %s3140_s17, %s3140_s17, %s3141_s24  }
 0x44e   : > { %s3987_s6 = sld [smem:[#allocation67_spill]]  ;;  %s1711_s17 = scalar_lea.sflag [#allocation9], %s3514_s21 }
 0x44f   : > { %s3008_s24 = scalar_lea.vmem %s3862_s16, 128  ;;  %p3988_p3 = scmp.ne.s32.totalorder %s3959_s2, 0 }
 0x450   : > { %p3009_p4 = scmp.ne.s32.totalorder %s3862_s16, %s3008_s24  ;;  %s3143_s14 = smov [#allocation19]  }
 0x451   : > { %s3012_s5 = sshll.u32 %s3143_s14, 4  ;;  %s3013_s5 = int_to_ptr.vmem [resolvable:$false] %s3012_s5 }
 0x452   : > { %p3010_p12 = pnand %p3009_p4, %p3988_p3  ;;  %s3014_s13 = scalar_lea.vmem %s3013_s5, 256 }
 0x453   : > { %p3015_p0 = scmp.lt.s32.totalorder %s3862_s16, %s3013_s5  ;;  %p3016_p9 = scmp.lt.s32.totalorder %s3014_s13, %s3008_s24 }
 0x454   : > { %s3860_s8 = scalar_lea.hbm %s3987_s6, %s2022_s27  ;;  %p3011_p5 = pneg %p3010_p12 }
 0x455   : > { %p3017_p13 = por %p3016_p9, %p3015_p0 }
 0x457   : > { %p3018_p1 = pnand %p3017_p13, %p3011_p5 }
 0x4ee   : > { %v1705_v33 = vpop.f32.mrb[0].mxu0 }
 0x4ef   : > { %v1706_v32 = vadd.f32 %v2020_v39, %v1705_v33  ;;  %v2088_v40 = vpop.f32.mrb[1].mxu0 }
 0x4f1   : > { %1709 = vst [vmem:[%s3532_s12] sm:$0xff] %v1706_v32 }
 0x4f2   : > { %3021 = shalt.err (!%p3018_p1)
}
 0x4f3   : > { %s3022_s21 = scalar_lea.hbm %s3860_s8, 128  ;;  %s3026_s10 = scalar_lea.hbm %s3987_s6, 256 }
 0x4f4   : > { %p3023_p7 = scmp.ne.s32.totalorder %s3860_s8, %s3022_s21  ;;  %p3027_p10 = scmp.lt.u32.totalorder %s3860_s8, %s3987_s6 }
 0x4f5   : > { %p3028_p6 = scmp.lt.u32.totalorder %s3026_s10, %s3022_s21  ;;  %p3030_p4 = scmp.lt.u32.totalorder %s3022_s21, %s3860_s8 }
 0x4f6   : > { %p3024_p8 = pnand %p3023_p7, %p3988_p3 }
 0x4f7   : > { %p3029_p2 = por %p3028_p6, %p3027_p10 }
 0x4f8   : > { %p3025_p11 = pneg %p3024_p8 }
 0x4f9   : > { %p3031_p12 = por %p3030_p4, %p3029_p2 }
 0x4fb   : > { %p3032_p5 = pnand %p3031_p12, %p3025_p11 }
 0x4fd   : > { %3035 = shalt.err (!%p3032_p5)
}
 0x4fe   : > { %2407 = dma.vmem_to_hbm [thread:$0]  (%p3988_p3), %s3862_s16, 128, %s3860_s8, %s1711_s17  }
 0x4ff   : > { %p3989_p0 = scmp.eq.s32.totalorder %s3243_s23, 1 }
 0x501   : > { %3091 = dma.done.wait (%p3989_p0), [#allocation21], 512   ;;  %p3990_p9 = pmov %p3989_p0 }
 0x503   : > { %3093 = vsyncadd (%p3990_p9), [#allocation21], 4294966784 }
 0x504 PF: > { %s1770_s4 = sand.u32 1, %s3100_s0   ;;  %p3991_p13 = scmp.ne.s32.totalorder %s3960_s15, 0 }
 0x505   : > { %p3992_p1 = scmp.ge.s32.totalorder %s3112_s20, 2  ;;  %s1771_s27 = scalar_lea.sflag [#allocation9], %s1770_s4 }
 0x507   : > { %p2441_p7 = pnand %p3992_p1, %p3991_p13 }
 0x509   : > { %3095 = dma.done.wait (!%p2441_p7), %s1771_s27, 128  }
 0x50a   : > { %3097 = vsyncadd (!%p2441_p7), %s1771_s27, 4294967168  ;;  %p36_p3 = scmp.ge.s32.totalorder %s3413_s25, 4   ;;  %s3993_s0 = smov %s3104_s18 }
 0x50b   : > { %s3994_s18 = smov %s3108_s19  ;;  %s3995_s19 = smov %s3424_s29 }
 0x50c   : > { %s3996_s20 = smov %s3413_s25  ;;  %38 = sbr.rel (!%p36_p3) target bundleno = 28 (0x1c), region = 216 }
 0x513   :  { %1776 = vsyncpa [#allocation8], 1 }
 0x514   :  { %1778 = vsyncpa [#allocation8 + $0x1], 1 }
 0x515   :  { %1779 = vsyncpa [#allocation11], 1 }
 0x516   :  { %1780 = vsyncpa [#allocation14], 1 }
 0x517   :  { %1781 = vsyncpa [#allocation17], 1 }
 0x518   :  { %1782 = vsyncpa [#allocation9], 1 }
 0x519   :  { %1784 = vsyncpa [#allocation9 + $0x1], 1 }
 0x51a   :  { %1785 = vsyncpa [#allocation21], 1 }
 0x51b   :  { %1786 = vsyncmov [#allocation3] }
 0x51e   :  { %s1787_s20 = vpop.sfrf %1786 }
 0x51f   :  { %p2029_p8 = scmp.ne.s32.totalorder %s1787_s20, 0 }
 0x521   :  { %1791 = shalt.err (%p2029_p8)  }
 0x522   :  { %1793 = vsyncmov [#allocation3 + $0x1] }
 0x525   :  { %s1794_s23 = vpop.sfrf %1793 }
 0x526   :  { %p2030_p11 = scmp.ne.s32.totalorder %s1794_s23, 0 }
 0x528   :  { %1798 = shalt.err (%p2030_p11)  }
 0x529   :  { %1800 = vsyncmov [#allocation3 + $0x2] }
 0x52c   :  { %s1801_s29 = vpop.sfrf %1800 }
 0x52d   :  { %p2031_p10 = scmp.ne.s32.totalorder %s1801_s29, 0 }
 0x52f   :  { %1805 = shalt.err (%p2031_p10)  }
 0x530   :  { %1807 = vsyncmov [#allocation3 + $0x3] }
 0x533   :  { %s1808_s11 = vpop.sfrf %1807 }
 0x534   :  { %p2032_p6 = scmp.ne.s32.totalorder %s1808_s11, 0 }
 0x536   :  { %1812 = shalt.err (%p2032_p6)  }
 0x537   :  { %1814 = vsyncmov [#allocation3 + $0x4] }
 0x53a   :  { %s1815_s0 = vpop.sfrf %1814 }
 0x53b   :  { %p2033_p2 = scmp.ne.s32.totalorder %s1815_s0, 0 }
 0x53d   :  { %1819 = shalt.err (%p2033_p2)  }
 0x53e   :  { %1821 = vsyncmov [#allocation3 + $0x5] }
 0x541   :  { %s1822_s18 = vpop.sfrf %1821 }
 0x542   :  { %p2034_p4 = scmp.ne.s32.totalorder %s1822_s18, 0 }
 0x544   :  { %1826 = shalt.err (%p2034_p4)  }
 0x545   :  { %1828 = vsyncmov [#allocation3 + $0x6] }
 0x548   :  { %s1829_s19 = vpop.sfrf %1828 }
 0x549   :  { %p2035_p12 = scmp.ne.s32.totalorder %s1829_s19, 0 }
 0x54b   :  { %1833 = shalt.err (%p2035_p12)  }
 0x54c   :  { %1835 = vsyncmov [#allocation3 + $0x7] }
 0x54f   :  { %s1836_s25 = vpop.sfrf %1835 }
 0x550   :  { %p2036_p5 = scmp.ne.s32.totalorder %s1836_s25, 0 }
 0x552   :  { %1840 = shalt.err (%p2036_p5)  }

</bundles_post_ra>
